<compile_context>
chip_gen: v7x
topology: tpu7x:2x2x1
jax: 0.10.0
libtpu: 0.0.40
codegen_flags: <defaults>
</compile_context>

<pallas_src>
import math
import jax
import jax.numpy as jnp
from jax.experimental import pallas as pl
from jax.experimental.pallas import tpu as pltpu

# ---------------- small synthetic BERT config ----------------
VOCAB = 100
MAX_POS = 32
TYPE_VOCAB = 2
HIDDEN = 32
HEADS = 2
HEAD_DIM = HIDDEN // HEADS
INTER = 64
LAYERS = 2
NUM_LABELS = 3          # len(['B-call', 'I-call', 'O'])
LABEL_PAD = 128         # lane-dense padded classifier width
EPS = 1e-12             # BERT layer-norm eps


# ---------------- parameters (deterministic synthetic init) ----------------
def init_params(key):
    def norm(k, shape):
        return jax.random.normal(k, shape, jnp.float32) * 0.02

    keys = iter(jax.random.split(key, 128))
    scale = 1.0 / math.sqrt(HEAD_DIM)

    params = {
        'word_emb': norm(next(keys), (VOCAB, HIDDEN)),
        'pos_emb': norm(next(keys), (MAX_POS, HIDDEN)),
        'type_emb': norm(next(keys), (TYPE_VOCAB, HIDDEN)),
        'emb_ln_g': jnp.ones((1, HIDDEN), jnp.float32),
        'emb_ln_b': jnp.zeros((1, HIDDEN), jnp.float32),
    }
    # classifier padded to a lane-dense 128-wide output (extra columns are zero
    # and are sliced off / masked out of the loss).  bf16 for the MXU.
    cls_w = norm(next(keys), (HIDDEN, NUM_LABELS))
    params['cls_w_pad'] = (jnp.zeros((HIDDEN, LABEL_PAD), jnp.float32)
                           .at[:, :NUM_LABELS].set(cls_w)).astype(jnp.bfloat16)
    params['cls_b_pad'] = jnp.zeros((1, LABEL_PAD), jnp.float32)

    qkv_w, qkv_b, o_w, o_b = [], [], [], []
    ln1_g, ln1_b, i_w, i_b, f_w, f_b, ln2_g, ln2_b = ([] for _ in range(8))
    for _ in range(LAYERS):
        # 1/sqrt(head_dim) folded into the Q weights (Q bias is zero here;
        # a nonzero Q bias would need the same rescale).
        qw = norm(next(keys), (HIDDEN, HIDDEN)) * scale
        kw = norm(next(keys), (HIDDEN, HIDDEN))
        vw = norm(next(keys), (HIDDEN, HIDDEN))
        qkv_w.append(jnp.concatenate([qw, kw, vw], axis=1))        # (H, 3H)
        qkv_b.append(jnp.zeros((1, 3 * HIDDEN), jnp.float32))
        o_w.append(norm(next(keys), (HIDDEN, HIDDEN)))
        o_b.append(jnp.zeros((1, HIDDEN), jnp.float32))
        ln1_g.append(jnp.ones((1, HIDDEN), jnp.float32))
        ln1_b.append(jnp.zeros((1, HIDDEN), jnp.float32))
        i_w.append(norm(next(keys), (HIDDEN, INTER)))
        i_b.append(jnp.zeros((1, INTER), jnp.float32))
        f_w.append(norm(next(keys), (INTER, HIDDEN)))
        f_b.append(jnp.zeros((1, HIDDEN), jnp.float32))
        ln2_g.append(jnp.ones((1, HIDDEN), jnp.float32))
        ln2_b.append(jnp.zeros((1, HIDDEN), jnp.float32))

    params.update(
        # matmul weights pre-cast to bf16 (MXU-native); biases / LN stay f32
        qkv_w=jnp.stack(qkv_w).astype(jnp.bfloat16),
        qkv_b=jnp.stack(qkv_b),
        o_w=jnp.stack(o_w).astype(jnp.bfloat16),
        o_b=jnp.stack(o_b),
        ln1_g=jnp.stack(ln1_g), ln1_b=jnp.stack(ln1_b),
        i_w=jnp.stack(i_w).astype(jnp.bfloat16),
        i_b=jnp.stack(i_b),
        f_w=jnp.stack(f_w).astype(jnp.bfloat16),
        f_b=jnp.stack(f_b),
        ln2_g=jnp.stack(ln2_g), ln2_b=jnp.stack(ln2_b),
    )
    return params


# ---------------- full forward: one fused Pallas kernel, layer grid ----------------
def bert_forward(params, input_ids, mask, labels):
    B, S = input_ids.shape
    M = B * S

    def kernel(emb_ref, bias_ref, onehot_ref, emb_g_ref, emb_b_ref,
               qkv_w_ref, qkv_b_ref, o_w_ref, o_b_ref,
               ln1_g_ref, ln1_b_ref, i_w_ref, i_b_ref,
               f_w_ref, f_b_ref, ln2_g_ref, ln2_b_ref,
               cls_w_ref, cls_b_ref,
               loss_ref, logits_ref, x_scr):
        layer = pl.program_id(0)

        def ln(v, g, b):                       # f32 layer-norm (BERT eps)
            mu = jnp.mean(v, axis=-1, keepdims=True)
            var = jnp.mean(jnp.square(v - mu), axis=-1, keepdims=True)
            return (v - mu) * jax.lax.rsqrt(var + EPS) * g + b

        # ---- layer 0: embedding layer-norm initialises the carried activation
        @pl.when(layer == 0)
        def _():
            x_scr[...] = ln(emb_ref[...], emb_g_ref[...], emb_b_ref[...])

        x = x_scr[...]                                           # (M, H) f32
        bias_bqk = bias_ref[...][:, None, :]                     # (B, 1, S) hoisted once per layer

        # fused Q/K/V projection: one bf16 (M,H)@(H,3H) MXU matmul, f32 accum
        qkv = jnp.dot(x.astype(jnp.bfloat16), qkv_w_ref[...],
                      preferred_element_type=jnp.float32) + qkv_b_ref[...]

        ctx_heads = []
        for h in range(HEADS):                                   # static unroll (2 heads)
            q0 = h * HEAD_DIM
            k0 = HIDDEN + h * HEAD_DIM
            v0 = 2 * HIDDEN + h * HEAD_DIM
            # 1/sqrt(dh) already folded into the Q weight columns at init
            q = qkv[:, q0:q0 + HEAD_DIM].reshape(B, S, HEAD_DIM)
            k = qkv[:, k0:k0 + HEAD_DIM].reshape(B, S, HEAD_DIM)
            v = qkv[:, v0:v0 + HEAD_DIM].reshape(B, S, HEAD_DIM)
            s = jnp.einsum('bqd,bkd->bqk',
                           q.astype(jnp.bfloat16), k.astype(jnp.bfloat16),
                           preferred_element_type=jnp.float32)
            s = s + bias_bqk
            mx = jnp.max(s, axis=-1, keepdims=True)
            p = jnp.exp(s - mx)
            p = p / jnp.sum(p, axis=-1, keepdims=True)           # exact softmax (f32)
            ctx = jnp.einsum('bqk,bkd->bqd',
                             p.astype(jnp.bfloat16), v.astype(jnp.bfloat16),
                             preferred_element_type=jnp.float32)
            ctx_heads.append(ctx.reshape(M, HEAD_DIM))
        # concat heads -> ONE output-projection matmul (no per-head dot+adds)
        ctx_all = jnp.concatenate(ctx_heads, axis=-1)            # (M, H) f32
        attn_out = jnp.dot(ctx_all.astype(jnp.bfloat16), o_w_ref[...],
                           preferred_element_type=jnp.float32) + o_b_ref[...]
        # residual add fused into layer-norm (dropout = identity)
        x = ln(attn_out + x, ln1_g_ref[...], ln1_b_ref[...])

        inter = jnp.dot(x.astype(jnp.bfloat16), i_w_ref[...],
                        preferred_element_type=jnp.float32) + i_b_ref[...]
        # TODO(synk): HF 'gelu' is the exact erf form; tanh approximation kept
        # for Mosaic-safe elementwise lowering (~1e-3 rel. deviation), f32 math.
        c = math.sqrt(2.0 / math.pi)
        inter = 0.5 * inter * (1.0 + jnp.tanh(
            c * (inter + 0.044715 * inter * inter * inter)))
        ff = jnp.dot(inter.astype(jnp.bfloat16), f_w_ref[...],
                     preferred_element_type=jnp.float32) + f_b_ref[...]
        x = ln(ff + x, ln2_g_ref[...], ln2_b_ref[...])           # dropout = identity
        x_scr[...] = x                                           # carry to next layer

        # ---- last layer: classifier + cross-entropy epilogue
        @pl.when(layer == LAYERS - 1)
        def _():
            logits = jnp.dot(x.astype(jnp.bfloat16), cls_w_ref[...],
                             preferred_element_type=jnp.float32) + cls_b_ref[...]
            logits_ref[...] = logits                             # (M, 128) lane-dense store

            onehot = onehot_ref[...]                             # (M, 128) lane-dense targets
            col = jax.lax.broadcasted_iota(jnp.int32, logits.shape, 1)
            masked = jnp.where(col < NUM_LABELS, logits, -1e30)  # pad cols out of softmax
            mx = jnp.max(masked, axis=-1, keepdims=True)
            lse = jnp.log(jnp.sum(jnp.exp(masked - mx),
                                  axis=-1, keepdims=True)) + mx
            tgt = jnp.sum(logits * onehot, axis=-1, keepdims=True)
            valid = jnp.sum(onehot, axis=-1, keepdims=True)      # 1.0 valid / 0.0 ignored
            per_row = (lse - tgt) * valid
            # max(.,1) guard: 0 instead of NaN when every label is ignore_index
            loss_ref[0, 0] = jnp.sum(per_row) / jnp.maximum(jnp.sum(valid), 1.0)

    # ---- JAX glue: embedding gathers + mask / label prep (no clean Pallas gather win) ----
    # token_type_ids == 0 (HF default when not supplied, matching the reference call)
    emb = (jnp.take(params['word_emb'], input_ids, axis=0)
           + params['pos_emb'][None, :S, :]
           + params['type_emb'][0][None, None, :])
    attn_bias = (1.0 - mask.astype(jnp.float32)) * -1e9          # (B, S) additive key mask

    labels_flat = labels.reshape(M)
    valid = (labels_flat != -100)                                # HF ignore_index
    onehot = (jax.nn.one_hot(jnp.where(valid, labels_flat, 0), LABEL_PAD,
                             dtype=jnp.float32)
              * valid[:, None].astype(jnp.float32))              # (M, 128) lane-dense

    lw = lambda blk: pl.BlockSpec(blk, lambda l: (l, 0, 0))      # per-layer streamed weight
    const2 = lambda blk: pl.BlockSpec(blk, lambda l: (0, 0))     # resident across layers

    grid_spec = pltpu.PrefetchScalarGridSpec(
        num_scalar_prefetch=0,
        grid=(LAYERS,),
        in_specs=[
            const2((M, HIDDEN)),                 # emb
            const2((B, S)),                      # attention bias
            const2((M, LABEL_PAD)),              # one-hot labels
            const2((1, HIDDEN)),                 # emb LN gamma
            const2((1, HIDDEN)),                 # emb LN beta
            lw((None, HIDDEN, 3 * HIDDEN)),      # qkv_w (bf16)
            lw((None, 1, 3 * HIDDEN)),           # qkv_b
            lw((None, HIDDEN, HIDDEN)),          # o_w (bf16)
            lw((None, 1, HIDDEN)),               # o_b
            lw((None, 1, HIDDEN)),               # ln1_g
            lw((None, 1, HIDDEN)),               # ln1_b
            lw((None, HIDDEN, INTER)),           # i_w (bf16)
            lw((None, 1, INTER)),                # i_b
            lw((None, INTER, HIDDEN)),           # f_w (bf16)
            lw((None, 1, HIDDEN)),               # f_b
            lw((None, 1, HIDDEN)),               # ln2_g
            lw((None, 1, HIDDEN)),               # ln2_b
            const2((HIDDEN, LABEL_PAD)),         # cls_w_pad (bf16)
            const2((1, LABEL_PAD)),              # cls_b_pad
        ],
        out_specs=(
            pl.BlockSpec(memory_space=pltpu.MemorySpace.SMEM),   # scalar loss
            pl.BlockSpec((M, LABEL_PAD), lambda l: (0, 0)),      # lane-dense logits
        ),
        scratch_shapes=[pltpu.VMEM((M, HIDDEN), jnp.float32)],   # activation carried across layers
    )

    loss, logits_pad = pl.pallas_call(
        kernel,
        out_shape=(jax.ShapeDtypeStruct((1, 1), jnp.float32),
                   jax.ShapeDtypeStruct((M, LABEL_PAD), jnp.float32)),
        grid_spec=grid_spec,
        compiler_params=pltpu.CompilerParams(
            dimension_semantics=("arbitrary",)),                 # layer axis is sequential
    )(emb.reshape(M, HIDDEN), attn_bias, onehot,
      params['emb_ln_g'], params['emb_ln_b'],
      params['qkv_w'], params['qkv_b'], params['o_w'], params['o_b'],
      params['ln1_g'], params['ln1_b'], params['i_w'], params['i_b'],
      params['f_w'], params['f_b'], params['ln2_g'], params['ln2_b'],
      params['cls_w_pad'], params['cls_b_pad'])

    logits = logits_pad[:, :NUM_LABELS].reshape(B, S, NUM_LABELS)
    return loss[0, 0], logits                                    # matches HF (loss, logits)


if __name__ == "__main__":
    key = jax.random.PRNGKey(0)
    pkey, ikey, lkey = jax.random.split(key, 3)
    params = init_params(pkey)

    B, S = 2, 8
    input_ids = jax.random.randint(ikey, (B, S), 0, VOCAB, dtype=jnp.int32)
    mask = jnp.ones((B, S), jnp.int32).at[:, -2:].set(0)          # last 2 tokens padded
    labels = jax.random.randint(lkey, (B, S), 0, NUM_LABELS, dtype=jnp.int32)
    labels = labels.at[:, -2:].set(-100)                          # HF ignore_index on pads

    loss, logits = jax.jit(bert_forward)(params, input_ids, mask, labels)
    jax.block_until_ready((loss, logits))
    assert logits.shape == (B, S, NUM_LABELS)
    assert bool(jnp.isfinite(loss))
    print("KERNEL_OK")
</pallas_src>

<mosaic_0001>
module attributes {stable_mosaic.version = 11 : i64} {
  func.func @kernel(%arg0: i32, %arg1: memref<16x32xf32, #tpu.memory_space<vmem>>, %arg2: memref<2x8xf32, #tpu.memory_space<vmem>>, %arg3: memref<16x128xf32, #tpu.memory_space<vmem>>, %arg4: memref<1x32xf32, #tpu.memory_space<vmem>>, %arg5: memref<1x32xf32, #tpu.memory_space<vmem>>, %arg6: memref<1x32x96xbf16, #tpu.memory_space<vmem>>, %arg7: memref<1x1x96xf32, #tpu.memory_space<vmem>>, %arg8: memref<1x32x32xbf16, #tpu.memory_space<vmem>>, %arg9: memref<1x1x32xf32, #tpu.memory_space<vmem>>, %arg10: memref<1x1x32xf32, #tpu.memory_space<vmem>>, %arg11: memref<1x1x32xf32, #tpu.memory_space<vmem>>, %arg12: memref<1x32x64xbf16, #tpu.memory_space<vmem>>, %arg13: memref<1x1x64xf32, #tpu.memory_space<vmem>>, %arg14: memref<1x64x32xbf16, #tpu.memory_space<vmem>>, %arg15: memref<1x1x32xf32, #tpu.memory_space<vmem>>, %arg16: memref<1x1x32xf32, #tpu.memory_space<vmem>>, %arg17: memref<1x1x32xf32, #tpu.memory_space<vmem>>, %arg18: memref<32x128xbf16, #tpu.memory_space<vmem>>, %arg19: memref<1x128xf32, #tpu.memory_space<vmem>>, %arg20: memref<1x1xf32, #tpu.memory_space<smem>>, %arg21: memref<16x128xf32, #tpu.memory_space<vmem>>, %arg22: memref<16x32xf32, #tpu.memory_space<vmem>>) attributes {dimension_semantics = [#tpu.dimension_semantics<arbitrary>], iteration_bounds = array<i64: 2>, scalar_prefetch = 0 : i64, scratch_operands = 1 : i64, tpu.core_type = #tpu.core_type<tc>, window_params = [{pipeline_mode = #tpu.pipeline_mode<synchronous>, transform_indices = @transform_0, window_bounds = array<i64: 16, 32>}, {pipeline_mode = #tpu.pipeline_mode<synchronous>, transform_indices = @transform_1, window_bounds = array<i64: 2, 8>}, {pipeline_mode = #tpu.pipeline_mode<synchronous>, transform_indices = @transform_2, window_bounds = array<i64: 16, 128>}, {pipeline_mode = #tpu.pipeline_mode<synchronous>, transform_indices = @transform_3, window_bounds = array<i64: 1, 32>}, {pipeline_mode = #tpu.pipeline_mode<synchronous>, transform_indices = @transform_4, window_bounds = array<i64: 1, 32>}, {transform_indices = @transform_5, window_bounds = array<i64: 1, 32, 96>}, {transform_indices = @transform_6, window_bounds = array<i64: 1, 1, 96>}, {transform_indices = @transform_7, window_bounds = array<i64: 1, 32, 32>}, {transform_indices = @transform_8, window_bounds = array<i64: 1, 1, 32>}, {transform_indices = @transform_9, window_bounds = array<i64: 1, 1, 32>}, {transform_indices = @transform_10, window_bounds = array<i64: 1, 1, 32>}, {transform_indices = @transform_11, window_bounds = array<i64: 1, 32, 64>}, {transform_indices = @transform_12, window_bounds = array<i64: 1, 1, 64>}, {transform_indices = @transform_13, window_bounds = array<i64: 1, 64, 32>}, {transform_indices = @transform_14, window_bounds = array<i64: 1, 1, 32>}, {transform_indices = @transform_15, window_bounds = array<i64: 1, 1, 32>}, {transform_indices = @transform_16, window_bounds = array<i64: 1, 1, 32>}, {pipeline_mode = #tpu.pipeline_mode<synchronous>, transform_indices = @transform_17, window_bounds = array<i64: 32, 128>}, {pipeline_mode = #tpu.pipeline_mode<synchronous>, transform_indices = @transform_18, window_bounds = array<i64: 1, 128>}, {transform_indices = @transform_19, window_bounds = array<i64: 1, 1>}, {pipeline_mode = #tpu.pipeline_mode<synchronous>, transform_indices = @transform_20, window_bounds = array<i64: 16, 128>}]} {
    %c0_i32 = arith.constant 0 : i32
    %0 = arith.cmpi eq, %arg0, %c0_i32 : i32
    %1 = arith.extui %0 : i1 to i32
    %c0_i32_0 = arith.constant 0 : i32
    %2 = arith.cmpi ne, %1, %c0_i32_0 : i32
    scf.if %2 {
      %c0_68 = arith.constant 0 : index
      %c0_69 = arith.constant 0 : index
      %158 = vector.load %arg1[%c0_68, %c0_69] : memref<16x32xf32, #tpu.memory_space<vmem>>, vector<16x32xf32>
      %c0_70 = arith.constant 0 : index
      %c0_71 = arith.constant 0 : index
      %159 = vector.load %arg4[%c0_70, %c0_71] : memref<1x32xf32, #tpu.memory_space<vmem>>, vector<1x32xf32>
      %c0_72 = arith.constant 0 : index
      %c0_73 = arith.constant 0 : index
      %160 = vector.load %arg5[%c0_72, %c0_73] : memref<1x32xf32, #tpu.memory_space<vmem>>, vector<1x32xf32>
      %cst_74 = arith.constant dense<0.000000e+00> : vector<16xf32>
      %161 = vector.multi_reduction <add>, %158, %cst_74 [1] : vector<16x32xf32> to vector<16xf32>
      %162 = vector.shape_cast %161 : vector<16xf32> to vector<16x1xf32>
      %cst_75 = arith.constant 3.200000e+01 : f32
      %163 = vector.broadcast %cst_75 : f32 to vector<16x1xf32>
      %164 = arith.divf %162, %163 : vector<16x1xf32>
      %165 = vector.broadcast %164 : vector<16x1xf32> to vector<16x32xf32>
      %166 = arith.subf %158, %165 : vector<16x32xf32>
      %167 = arith.mulf %166, %166 : vector<16x32xf32>
      %cst_76 = arith.constant dense<0.000000e+00> : vector<16xf32>
      %168 = vector.multi_reduction <add>, %167, %cst_76 [1] : vector<16x32xf32> to vector<16xf32>
      %169 = vector.shape_cast %168 : vector<16xf32> to vector<16x1xf32>
      %cst_77 = arith.constant 3.200000e+01 : f32
      %170 = vector.broadcast %cst_77 : f32 to vector<16x1xf32>
      %171 = arith.divf %169, %170 : vector<16x1xf32>
      %172 = vector.broadcast %164 : vector<16x1xf32> to vector<16x32xf32>
      %173 = arith.subf %158, %172 : vector<16x32xf32>
      %cst_78 = arith.constant 9.99999996E-13 : f32
      %174 = vector.broadcast %cst_78 : f32 to vector<16x1xf32>
      %175 = arith.addf %171, %174 : vector<16x1xf32>
      %176 = math.rsqrt %175 : vector<16x1xf32>
      %177 = vector.broadcast %176 : vector<16x1xf32> to vector<16x32xf32>
      %178 = arith.mulf %173, %177 : vector<16x32xf32>
      %179 = vector.broadcast %159 : vector<1x32xf32> to vector<16x32xf32>
      %180 = arith.mulf %178, %179 : vector<16x32xf32>
      %181 = vector.broadcast %160 : vector<1x32xf32> to vector<16x32xf32>
      %182 = arith.addf %180, %181 : vector<16x32xf32>
      %c0_79 = arith.constant 0 : index
      %c0_80 = arith.constant 0 : index
      %183 = vector.load %arg22[%c0_79, %c0_80] : memref<16x32xf32, #tpu.memory_space<vmem>>, vector<16x32xf32>
      tpu.vector_store %arg22[%c0_79, %c0_80], %182 {strides = array<i32>} : memref<16x32xf32, #tpu.memory_space<vmem>>, vector<16x32xf32>,
    } else {
    }
    %c0 = arith.constant 0 : index
    %c0_1 = arith.constant 0 : index
    %3 = vector.load %arg22[%c0, %c0_1] : memref<16x32xf32, #tpu.memory_space<vmem>>, vector<16x32xf32>
    %c0_2 = arith.constant 0 : index
    %c0_3 = arith.constant 0 : index
    %4 = vector.load %arg2[%c0_2, %c0_3] : memref<2x8xf32, #tpu.memory_space<vmem>>, vector<2x8xf32>
    %5 = vector.shape_cast %4 : vector<2x8xf32> to vector<2x1x8xf32>
    %6 = arith.truncf %3 : vector<16x32xf32> to vector<16x32xbf16>
    %c0_4 = arith.constant 0 : index
    %c0_5 = arith.constant 0 : index
    %c0_6 = arith.constant 0 : index
    %7 = vector.load %arg6[%c0_4, %c0_5, %c0_6] : memref<1x32x96xbf16, #tpu.memory_space<vmem>>, vector<1x32x96xbf16>
    %8 = vector.shape_cast %7 : vector<1x32x96xbf16> to vector<32x96xbf16>
    %cst = arith.constant dense<0.000000e+00> : vector<16x96xf32>
    %9 = tpu.matmul %6, %8, %cst {dimension_numbers = #tpu.dot_dimension_numbers<[1], [0], [0], [1], [0, 0, 1, 1], [], []>} : vector<16x32xbf16>, vector<32x96xbf16>, vector<16x96xf32> -> vector<16x96xf32>
    %c0_7 = arith.constant 0 : index
    %c0_8 = arith.constant 0 : index
    %c0_9 = arith.constant 0 : index
    %10 = vector.load %arg7[%c0_7, %c0_8, %c0_9] : memref<1x1x96xf32, #tpu.memory_space<vmem>>, vector<1x1x96xf32>
    %11 = vector.shape_cast %10 : vector<1x1x96xf32> to vector<1x96xf32>
    %12 = vector.broadcast %11 : vector<1x96xf32> to vector<16x96xf32>
    %13 = arith.addf %9, %12 : vector<16x96xf32>
    %14 = vector.extract_strided_slice %13 {offsets = [0, 0], sizes = [16, 16], strides = [1, 1]} : vector<16x96xf32> to vector<16x16xf32>
    %15 = vector.shape_cast %14 : vector<16x16xf32> to vector<2x8x16xf32>
    %16 = vector.extract_strided_slice %13 {offsets = [0, 32], sizes = [16, 16], strides = [1, 1]} : vector<16x96xf32> to vector<16x16xf32>
    %17 = vector.shape_cast %16 : vector<16x16xf32> to vector<2x8x16xf32>
    %18 = vector.extract_strided_slice %13 {offsets = [0, 64], sizes = [16, 16], strides = [1, 1]} : vector<16x96xf32> to vector<16x16xf32>
    %19 = vector.shape_cast %18 : vector<16x16xf32> to vector<2x8x16xf32>
    %20 = arith.truncf %15 : vector<2x8x16xf32> to vector<2x8x16xbf16>
    %21 = arith.truncf %17 : vector<2x8x16xf32> to vector<2x8x16xbf16>
    "tpu.trace_start"() <{level = 10 : i32, message = "bqd,bkd->bqk"}> : () -> ()
    %cst_10 = arith.constant dense<0.000000e+00> : vector<2x8x8xf32>
    %22 = tpu.matmul %20, %21, %cst_10 {dimension_numbers = #tpu.dot_dimension_numbers<[2], [2], [1], [1], [0, 0, 0, 1, 1, 1], [0], [0]>} : vector<2x8x16xbf16>, vector<2x8x16xbf16>, vector<2x8x8xf32> -> vector<2x8x8xf32>
    "tpu.trace_stop"() : () -> ()
    %23 = vector.broadcast %5 : vector<2x1x8xf32> to vector<2x8x8xf32>
    %24 = arith.addf %22, %23 : vector<2x8x8xf32>
    %cst_11 = arith.constant dense<0xFF800000> : vector<2x8xf32>
    %25 = vector.multi_reduction <maximumf>, %24, %cst_11 [2] : vector<2x8x8xf32> to vector<2x8xf32>
    %26 = vector.shape_cast %25 : vector<2x8xf32> to vector<2x8x1xf32>
    %27 = vector.broadcast %26 : vector<2x8x1xf32> to vector<2x8x8xf32>
    %28 = arith.subf %24, %27 : vector<2x8x8xf32>
    %29 = math.exp %28 : vector<2x8x8xf32>
    %cst_12 = arith.constant dense<0.000000e+00> : vector<2x8xf32>
    %30 = vector.multi_reduction <add>, %29, %cst_12 [2] : vector<2x8x8xf32> to vector<2x8xf32>
    %31 = vector.shape_cast %30 : vector<2x8xf32> to vector<2x8x1xf32>
    %32 = vector.broadcast %31 : vector<2x8x1xf32> to vector<2x8x8xf32>
    %33 = arith.divf %29, %32 : vector<2x8x8xf32>
    %34 = arith.truncf %33 : vector<2x8x8xf32> to vector<2x8x8xbf16>
    %35 = arith.truncf %19 : vector<2x8x16xf32> to vector<2x8x16xbf16>
    "tpu.trace_start"() <{level = 10 : i32, message = "bqk,bkd->bqd"}> : () -> ()
    %cst_13 = arith.constant dense<0.000000e+00> : vector<2x8x16xf32>
    %36 = tpu.matmul %34, %35, %cst_13 {dimension_numbers = #tpu.dot_dimension_numbers<[2], [1], [1], [2], [0, 0, 0, 1, 1, 2], [0], [0]>} : vector<2x8x8xbf16>, vector<2x8x16xbf16>, vector<2x8x16xf32> -> vector<2x8x16xf32>
    "tpu.trace_stop"() : () -> ()
    %37 = vector.shape_cast %36 : vector<2x8x16xf32> to vector<16x16xf32>
    %38 = vector.extract_strided_slice %13 {offsets = [0, 16], sizes = [16, 16], strides = [1, 1]} : vector<16x96xf32> to vector<16x16xf32>
    %39 = vector.shape_cast %38 : vector<16x16xf32> to vector<2x8x16xf32>
    %40 = vector.extract_strided_slice %13 {offsets = [0, 48], sizes = [16, 16], strides = [1, 1]} : vector<16x96xf32> to vector<16x16xf32>
    %41 = vector.shape_cast %40 : vector<16x16xf32> to vector<2x8x16xf32>
    %42 = vector.extract_strided_slice %13 {offsets = [0, 80], sizes = [16, 16], strides = [1, 1]} : vector<16x96xf32> to vector<16x16xf32>
    %43 = vector.shape_cast %42 : vector<16x16xf32> to vector<2x8x16xf32>
    %44 = arith.truncf %39 : vector<2x8x16xf32> to vector<2x8x16xbf16>
    %45 = arith.truncf %41 : vector<2x8x16xf32> to vector<2x8x16xbf16>
    "tpu.trace_start"() <{level = 10 : i32, message = "bqd,bkd->bqk"}> : () -> ()
    %cst_14 = arith.constant dense<0.000000e+00> : vector<2x8x8xf32>
    %46 = tpu.matmul %44, %45, %cst_14 {dimension_numbers = #tpu.dot_dimension_numbers<[2], [2], [1], [1], [0, 0, 0, 1, 1, 1], [0], [0]>} : vector<2x8x16xbf16>, vector<2x8x16xbf16>, vector<2x8x8xf32> -> vector<2x8x8xf32>
    "tpu.trace_stop"() : () -> ()
    %47 = vector.broadcast %5 : vector<2x1x8xf32> to vector<2x8x8xf32>
    %48 = arith.addf %46, %47 : vector<2x8x8xf32>
    %cst_15 = arith.constant dense<0xFF800000> : vector<2x8xf32>
    %49 = vector.multi_reduction <maximumf>, %48, %cst_15 [2] : vector<2x8x8xf32> to vector<2x8xf32>
    %50 = vector.shape_cast %49 : vector<2x8xf32> to vector<2x8x1xf32>
    %51 = vector.broadcast %50 : vector<2x8x1xf32> to vector<2x8x8xf32>
    %52 = arith.subf %48, %51 : vector<2x8x8xf32>
    %53 = math.exp %52 : vector<2x8x8xf32>
    %cst_16 = arith.constant dense<0.000000e+00> : vector<2x8xf32>
    %54 = vector.multi_reduction <add>, %53, %cst_16 [2] : vector<2x8x8xf32> to vector<2x8xf32>
    %55 = vector.shape_cast %54 : vector<2x8xf32> to vector<2x8x1xf32>
    %56 = vector.broadcast %55 : vector<2x8x1xf32> to vector<2x8x8xf32>
    %57 = arith.divf %53, %56 : vector<2x8x8xf32>
    %58 = arith.truncf %57 : vector<2x8x8xf32> to vector<2x8x8xbf16>
    %59 = arith.truncf %43 : vector<2x8x16xf32> to vector<2x8x16xbf16>
    "tpu.trace_start"() <{level = 10 : i32, message = "bqk,bkd->bqd"}> : () -> ()
    %cst_17 = arith.constant dense<0.000000e+00> : vector<2x8x16xf32>
    %60 = tpu.matmul %58, %59, %cst_17 {dimension_numbers = #tpu.dot_dimension_numbers<[2], [1], [1], [2], [0, 0, 0, 1, 1, 2], [0], [0]>} : vector<2x8x8xbf16>, vector<2x8x16xbf16>, vector<2x8x16xf32> -> vector<2x8x16xf32>
    "tpu.trace_stop"() : () -> ()
    %61 = vector.shape_cast %60 : vector<2x8x16xf32> to vector<16x16xf32>
    %62 = tpu.concatenate %37, %61 in 1 : vector<16x16xf32>, vector<16x16xf32> -> vector<16x32xf32>
    %63 = arith.truncf %62 : vector<16x32xf32> to vector<16x32xbf16>
    %c0_18 = arith.constant 0 : index
    %c0_19 = arith.constant 0 : index
    %c0_20 = arith.constant 0 : index
    %64 = vector.load %arg8[%c0_18, %c0_19, %c0_20] : memref<1x32x32xbf16, #tpu.memory_space<vmem>>, vector<1x32x32xbf16>
    %65 = vector.shape_cast %64 : vector<1x32x32xbf16> to vector<32x32xbf16>
    %cst_21 = arith.constant dense<0.000000e+00> : vector<16x32xf32>
    %66 = tpu.matmul %63, %65, %cst_21 {dimension_numbers = #tpu.dot_dimension_numbers<[1], [0], [0], [1], [0, 0, 1, 1], [], []>} : vector<16x32xbf16>, vector<32x32xbf16>, vector<16x32xf32> -> vector<16x32xf32>
    %c0_22 = arith.constant 0 : index
    %c0_23 = arith.constant 0 : index
    %c0_24 = arith.constant 0 : index
    %67 = vector.load %arg9[%c0_22, %c0_23, %c0_24] : memref<1x1x32xf32, #tpu.memory_space<vmem>>, vector<1x1x32xf32>
    %68 = vector.shape_cast %67 : vector<1x1x32xf32> to vector<1x32xf32>
    %69 = vector.broadcast %68 : vector<1x32xf32> to vector<16x32xf32>
    %70 = arith.addf %66, %69 : vector<16x32xf32>
    %71 = arith.addf %70, %3 : vector<16x32xf32>
    %c0_25 = arith.constant 0 : index
    %c0_26 = arith.constant 0 : index
    %c0_27 = arith.constant 0 : index
    %72 = vector.load %arg10[%c0_25, %c0_26, %c0_27] : memref<1x1x32xf32, #tpu.memory_space<vmem>>, vector<1x1x32xf32>
    %73 = vector.shape_cast %72 : vector<1x1x32xf32> to vector<1x32xf32>
    %c0_28 = arith.constant 0 : index
    %c0_29 = arith.constant 0 : index
    %c0_30 = arith.constant 0 : index
    %74 = vector.load %arg11[%c0_28, %c0_29, %c0_30] : memref<1x1x32xf32, #tpu.memory_space<vmem>>, vector<1x1x32xf32>
    %75 = vector.shape_cast %74 : vector<1x1x32xf32> to vector<1x32xf32>
    %cst_31 = arith.constant dense<0.000000e+00> : vector<16xf32>
    %76 = vector.multi_reduction <add>, %71, %cst_31 [1] : vector<16x32xf32> to vector<16xf32>
    %77 = vector.shape_cast %76 : vector<16xf32> to vector<16x1xf32>
    %cst_32 = arith.constant 3.200000e+01 : f32
    %78 = vector.broadcast %cst_32 : f32 to vector<16x1xf32>
    %79 = arith.divf %77, %78 : vector<16x1xf32>
    %80 = vector.broadcast %79 : vector<16x1xf32> to vector<16x32xf32>
    %81 = arith.subf %71, %80 : vector<16x32xf32>
    %82 = arith.mulf %81, %81 : vector<16x32xf32>
    %cst_33 = arith.constant dense<0.000000e+00> : vector<16xf32>
    %83 = vector.multi_reduction <add>, %82, %cst_33 [1] : vector<16x32xf32> to vector<16xf32>
    %84 = vector.shape_cast %83 : vector<16xf32> to vector<16x1xf32>
    %cst_34 = arith.constant 3.200000e+01 : f32
    %85 = vector.broadcast %cst_34 : f32 to vector<16x1xf32>
    %86 = arith.divf %84, %85 : vector<16x1xf32>
    %87 = vector.broadcast %79 : vector<16x1xf32> to vector<16x32xf32>
    %88 = arith.subf %71, %87 : vector<16x32xf32>
    %cst_35 = arith.constant 9.99999996E-13 : f32
    %89 = vector.broadcast %cst_35 : f32 to vector<16x1xf32>
    %90 = arith.addf %86, %89 : vector<16x1xf32>
    %91 = math.rsqrt %90 : vector<16x1xf32>
    %92 = vector.broadcast %91 : vector<16x1xf32> to vector<16x32xf32>
    %93 = arith.mulf %88, %92 : vector<16x32xf32>
    %94 = vector.broadcast %73 : vector<1x32xf32> to vector<16x32xf32>
    %95 = arith.mulf %93, %94 : vector<16x32xf32>
    %96 = vector.broadcast %75 : vector<1x32xf32> to vector<16x32xf32>
    %97 = arith.addf %95, %96 : vector<16x32xf32>
    %98 = arith.truncf %97 : vector<16x32xf32> to vector<16x32xbf16>
    %c0_36 = arith.constant 0 : index
    %c0_37 = arith.constant 0 : index
    %c0_38 = arith.constant 0 : index
    %99 = vector.load %arg12[%c0_36, %c0_37, %c0_38] : memref<1x32x64xbf16, #tpu.memory_space<vmem>>, vector<1x32x64xbf16>
    %100 = vector.shape_cast %99 : vector<1x32x64xbf16> to vector<32x64xbf16>
    %cst_39 = arith.constant dense<0.000000e+00> : vector<16x64xf32>
    %101 = tpu.matmul %98, %100, %cst_39 {dimension_numbers = #tpu.dot_dimension_numbers<[1], [0], [0], [1], [0, 0, 1, 1], [], []>} : vector<16x32xbf16>, vector<32x64xbf16>, vector<16x64xf32> -> vector<16x64xf32>
    %c0_40 = arith.constant 0 : index
    %c0_41 = arith.constant 0 : index
    %c0_42 = arith.constant 0 : index
    %102 = vector.load %arg13[%c0_40, %c0_41, %c0_42] : memref<1x1x64xf32, #tpu.memory_space<vmem>>, vector<1x1x64xf32>
    %103 = vector.shape_cast %102 : vector<1x1x64xf32> to vector<1x64xf32>
    %104 = vector.broadcast %103 : vector<1x64xf32> to vector<16x64xf32>
    %105 = arith.addf %101, %104 : vector<16x64xf32>
    %cst_43 = arith.constant 5.000000e-01 : f32
    %106 = vector.broadcast %cst_43 : f32 to vector<16x64xf32>
    %107 = arith.mulf %106, %105 : vector<16x64xf32>
    %cst_44 = arith.constant 4.471500e-02 : f32
    %108 = vector.broadcast %cst_44 : f32 to vector<16x64xf32>
    %109 = arith.mulf %108, %105 : vector<16x64xf32>
    %110 = arith.mulf %109, %105 : vector<16x64xf32>
    %111 = arith.mulf %110, %105 : vector<16x64xf32>
    %112 = arith.addf %105, %111 : vector<16x64xf32>
    %cst_45 = arith.constant 0.797884583 : f32
    %113 = vector.broadcast %cst_45 : f32 to vector<16x64xf32>
    %114 = arith.mulf %113, %112 : vector<16x64xf32>
    %115 = math.tanh %114 : vector<16x64xf32>
    %cst_46 = arith.constant 1.000000e+00 : f32
    %116 = vector.broadcast %cst_46 : f32 to vector<16x64xf32>
    %117 = arith.addf %116, %115 : vector<16x64xf32>
    %118 = arith.mulf %107, %117 : vector<16x64xf32>
    %119 = arith.truncf %118 : vector<16x64xf32> to vector<16x64xbf16>
    %c0_47 = arith.constant 0 : index
    %c0_48 = arith.constant 0 : index
    %c0_49 = arith.constant 0 : index
    %120 = vector.load %arg14[%c0_47, %c0_48, %c0_49] : memref<1x64x32xbf16, #tpu.memory_space<vmem>>, vector<1x64x32xbf16>
    %121 = vector.shape_cast %120 : vector<1x64x32xbf16> to vector<64x32xbf16>
    %cst_50 = arith.constant dense<0.000000e+00> : vector<16x32xf32>
    %122 = tpu.matmul %119, %121, %cst_50 {dimension_numbers = #tpu.dot_dimension_numbers<[1], [0], [0], [1], [0, 0, 1, 1], [], []>} : vector<16x64xbf16>, vector<64x32xbf16>, vector<16x32xf32> -> vector<16x32xf32>
    %c0_51 = arith.constant 0 : index
    %c0_52 = arith.constant 0 : index
    %c0_53 = arith.constant 0 : index
    %123 = vector.load %arg15[%c0_51, %c0_52, %c0_53] : memref<1x1x32xf32, #tpu.memory_space<vmem>>, vector<1x1x32xf32>
    %124 = vector.shape_cast %123 : vector<1x1x32xf32> to vector<1x32xf32>
    %125 = vector.broadcast %124 : vector<1x32xf32> to vector<16x32xf32>
    %126 = arith.addf %122, %125 : vector<16x32xf32>
    %127 = arith.addf %126, %97 : vector<16x32xf32>
    %c0_54 = arith.constant 0 : index
    %c0_55 = arith.constant 0 : index
    %c0_56 = arith.constant 0 : index
    %128 = vector.load %arg16[%c0_54, %c0_55, %c0_56] : memref<1x1x32xf32, #tpu.memory_space<vmem>>, vector<1x1x32xf32>
    %129 = vector.shape_cast %128 : vector<1x1x32xf32> to vector<1x32xf32>
    %c0_57 = arith.constant 0 : index
    %c0_58 = arith.constant 0 : index
    %c0_59 = arith.constant 0 : index
    %130 = vector.load %arg17[%c0_57, %c0_58, %c0_59] : memref<1x1x32xf32, #tpu.memory_space<vmem>>, vector<1x1x32xf32>
    %131 = vector.shape_cast %130 : vector<1x1x32xf32> to vector<1x32xf32>
    %cst_60 = arith.constant dense<0.000000e+00> : vector<16xf32>
    %132 = vector.multi_reduction <add>, %127, %cst_60 [1] : vector<16x32xf32> to vector<16xf32>
    %133 = vector.shape_cast %132 : vector<16xf32> to vector<16x1xf32>
    %cst_61 = arith.constant 3.200000e+01 : f32
    %134 = vector.broadcast %cst_61 : f32 to vector<16x1xf32>
    %135 = arith.divf %133, %134 : vector<16x1xf32>
    %136 = vector.broadcast %135 : vector<16x1xf32> to vector<16x32xf32>
    %137 = arith.subf %127, %136 : vector<16x32xf32>
    %138 = arith.mulf %137, %137 : vector<16x32xf32>
    %cst_62 = arith.constant dense<0.000000e+00> : vector<16xf32>
    %139 = vector.multi_reduction <add>, %138, %cst_62 [1] : vector<16x32xf32> to vector<16xf32>
    %140 = vector.shape_cast %139 : vector<16xf32> to vector<16x1xf32>
    %cst_63 = arith.constant 3.200000e+01 : f32
    %141 = vector.broadcast %cst_63 : f32 to vector<16x1xf32>
    %142 = arith.divf %140, %141 : vector<16x1xf32>
    %143 = vector.broadcast %135 : vector<16x1xf32> to vector<16x32xf32>
    %144 = arith.subf %127, %143 : vector<16x32xf32>
    %cst_64 = arith.constant 9.99999996E-13 : f32
    %145 = vector.broadcast %cst_64 : f32 to vector<16x1xf32>
    %146 = arith.addf %142, %145 : vector<16x1xf32>
    %147 = math.rsqrt %146 : vector<16x1xf32>
    %148 = vector.broadcast %147 : vector<16x1xf32> to vector<16x32xf32>
    %149 = arith.mulf %144, %148 : vector<16x32xf32>
    %150 = vector.broadcast %129 : vector<1x32xf32> to vector<16x32xf32>
    %151 = arith.mulf %149, %150 : vector<16x32xf32>
    %152 = vector.broadcast %131 : vector<1x32xf32> to vector<16x32xf32>
    %153 = arith.addf %151, %152 : vector<16x32xf32>
    %c0_65 = arith.constant 0 : index
    %c0_66 = arith.constant 0 : index
    %154 = vector.load %arg22[%c0_65, %c0_66] : memref<16x32xf32, #tpu.memory_space<vmem>>, vector<16x32xf32>
    tpu.vector_store %arg22[%c0_65, %c0_66], %153 {strides = array<i32>} : memref<16x32xf32, #tpu.memory_space<vmem>>, vector<16x32xf32>,
    %c1_i32 = arith.constant 1 : i32
    %155 = arith.cmpi eq, %arg0, %c1_i32 : i32
    %156 = arith.extui %155 : i1 to i32
    %c0_i32_67 = arith.constant 0 : i32
    %157 = arith.cmpi ne, %156, %c0_i32_67 : i32
    scf.if %157 {
      %158 = arith.truncf %153 : vector<16x32xf32> to vector<16x32xbf16>
      %c0_68 = arith.constant 0 : index
      %c0_69 = arith.constant 0 : index
      %159 = vector.load %arg18[%c0_68, %c0_69] : memref<32x128xbf16, #tpu.memory_space<vmem>>, vector<32x128xbf16>
      %cst_70 = arith.constant dense<0.000000e+00> : vector<16x128xf32>
      %160 = tpu.matmul %158, %159, %cst_70 {dimension_numbers = #tpu.dot_dimension_numbers<[1], [0], [0], [1], [0, 0, 1, 1], [], []>} : vector<16x32xbf16>, vector<32x128xbf16>, vector<16x128xf32> -> vector<16x128xf32>
      %c0_71 = arith.constant 0 : index
      %c0_72 = arith.constant 0 : index
      %161 = vector.load %arg19[%c0_71, %c0_72] : memref<1x128xf32, #tpu.memory_space<vmem>>, vector<1x128xf32>
      %162 = vector.broadcast %161 : vector<1x128xf32> to vector<16x128xf32>
      %163 = arith.addf %160, %162 : vector<16x128xf32>
      %c0_73 = arith.constant 0 : index
      %c0_74 = arith.constant 0 : index
      %164 = vector.load %arg21[%c0_73, %c0_74] : memref<16x128xf32, #tpu.memory_space<vmem>>, vector<16x128xf32>
      tpu.vector_store %arg21[%c0_73, %c0_74], %163 {strides = array<i32>} : memref<16x128xf32, #tpu.memory_space<vmem>>, vector<16x128xf32>,
      %c0_75 = arith.constant 0 : index
      %c0_76 = arith.constant 0 : index
      %165 = vector.load %arg3[%c0_75, %c0_76] : memref<16x128xf32, #tpu.memory_space<vmem>>, vector<16x128xf32>
      %166 = tpu.iota {dimensions = array<i32: 1>} : vector<16x128xi32>
      %c3_i32 = arith.constant 3 : i32
      %167 = vector.broadcast %c3_i32 : i32 to vector<16x128xi32>
      %168 = arith.cmpi slt, %166, %167 : vector<16x128xi32>
      %cst_77 = arith.constant -1.000000e+30 : f32
      %169 = vector.broadcast %cst_77 : f32 to vector<16x128xf32>
      %170 = arith.select %168, %163, %169 : vector<16x128xi1>, vector<16x128xf32>
      %cst_78 = arith.constant dense<0xFF800000> : vector<16xf32>
      %171 = vector.multi_reduction <maximumf>, %170, %cst_78 [1] : vector<16x128xf32> to vector<16xf32>
      %172 = vector.shape_cast %171 : vector<16xf32> to vector<16x1xf32>
      %173 = vector.broadcast %172 : vector<16x1xf32> to vector<16x128xf32>
      %174 = arith.subf %170, %173 : vector<16x128xf32>
      %175 = math.exp %174 : vector<16x128xf32>
      %cst_79 = arith.constant dense<0.000000e+00> : vector<16xf32>
      %176 = vector.multi_reduction <add>, %175, %cst_79 [1] : vector<16x128xf32> to vector<16xf32>
      %177 = vector.shape_cast %176 : vector<16xf32> to vector<16x1xf32>
      %178 = math.log %177 : vector<16x1xf32>
      %179 = arith.addf %178, %172 : vector<16x1xf32>
      %180 = arith.mulf %163, %165 : vector<16x128xf32>
      %cst_80 = arith.constant dense<0.000000e+00> : vector<16xf32>
      %181 = vector.multi_reduction <add>, %180, %cst_80 [1] : vector<16x128xf32> to vector<16xf32>
      %182 = vector.shape_cast %181 : vector<16xf32> to vector<16x1xf32>
      %cst_81 = arith.constant dense<0.000000e+00> : vector<16xf32>
      %183 = vector.multi_reduction <add>, %165, %cst_81 [1] : vector<16x128xf32> to vector<16xf32>
      %184 = vector.shape_cast %183 : vector<16xf32> to vector<16x1xf32>
      %185 = arith.subf %179, %182 : vector<16x1xf32>
      %186 = arith.mulf %185, %184 : vector<16x1xf32>
      %187 = vector.shape_cast %186 : vector<16x1xf32> to vector<1x16x1xf32>
      %cst_82 = arith.constant dense<0.000000e+00> : vector<1xf32>
      %188 = vector.multi_reduction <add>, %187, %cst_82 [1, 2] : vector<1x16x1xf32> to vector<1xf32>
      %189 = vector.shape_cast %188 : vector<1xf32> to vector<1x1x1xf32>
      %190 = vector.extract %189[0, 0, 0] : f32 from vector<1x1x1xf32>
      %191 = vector.shape_cast %184 : vector<16x1xf32> to vector<1x16x1xf32>
      %cst_83 = arith.constant dense<0.000000e+00> : vector<1xf32>
      %192 = vector.multi_reduction <add>, %191, %cst_83 [1, 2] : vector<1x16x1xf32> to vector<1xf32>
      %193 = vector.shape_cast %192 : vector<1xf32> to vector<1x1x1xf32>
      %194 = vector.extract %193[0, 0, 0] : f32 from vector<1x1x1xf32>
      %cst_84 = arith.constant 1.000000e+00 : f32
      %195 = arith.maximumf %194, %cst_84 : f32
      %196 = arith.divf %190, %195 : f32
      %c0_85 = arith.constant 0 : index
      %c0_86 = arith.constant 0 : index
      %197 = memref.load %arg20[%c0_85, %c0_86] : memref<1x1xf32, #tpu.memory_space<smem>>
      memref.store %196, %arg20[%c0_85, %c0_86] : memref<1x1xf32, #tpu.memory_space<smem>>
    } else {
    }
    return
  }
  func.func @transform_0(%arg0: i32) -> (i32, i32) {
    %c0_i32 = arith.constant 0 : i32
    %c0_i32_0 = arith.constant 0 : i32
    %c0_i32_1 = arith.constant 0 : i32
    return %c0_i32, %c0_i32_0 : i32, i32
  }
  func.func @transform_1(%arg0: i32) -> (i32, i32) {
    %c0_i32 = arith.constant 0 : i32
    %c0_i32_0 = arith.constant 0 : i32
    %c0_i32_1 = arith.constant 0 : i32
    return %c0_i32, %c0_i32_0 : i32, i32
  }
  func.func @transform_2(%arg0: i32) -> (i32, i32) {
    %c0_i32 = arith.constant 0 : i32
    %c0_i32_0 = arith.constant 0 : i32
    %c0_i32_1 = arith.constant 0 : i32
    return %c0_i32, %c0_i32_0 : i32, i32
  }
  func.func @transform_3(%arg0: i32) -> (i32, i32) {
    %c0_i32 = arith.constant 0 : i32
    %c0_i32_0 = arith.constant 0 : i32
    %c0_i32_1 = arith.constant 0 : i32
    return %c0_i32, %c0_i32_0 : i32, i32
  }
  func.func @transform_4(%arg0: i32) -> (i32, i32) {
    %c0_i32 = arith.constant 0 : i32
    %c0_i32_0 = arith.constant 0 : i32
    %c0_i32_1 = arith.constant 0 : i32
    return %c0_i32, %c0_i32_0 : i32, i32
  }
  func.func @transform_5(%arg0: i32) -> (i32, i32, i32) {
    %c0_i32 = arith.constant 0 : i32
    %c0_i32_0 = arith.constant 0 : i32
    %c0_i32_1 = arith.constant 0 : i32
    return %arg0, %c0_i32, %c0_i32_0 : i32, i32, i32
  }
  func.func @transform_6(%arg0: i32) -> (i32, i32, i32) {
    %c0_i32 = arith.constant 0 : i32
    %c0_i32_0 = arith.constant 0 : i32
    %c0_i32_1 = arith.constant 0 : i32
    return %arg0, %c0_i32, %c0_i32_0 : i32, i32, i32
  }
  func.func @transform_7(%arg0: i32) -> (i32, i32, i32) {
    %c0_i32 = arith.constant 0 : i32
    %c0_i32_0 = arith.constant 0 : i32
    %c0_i32_1 = arith.constant 0 : i32
    return %arg0, %c0_i32, %c0_i32_0 : i32, i32, i32
  }
  func.func @transform_8(%arg0: i32) -> (i32, i32, i32) {
    %c0_i32 = arith.constant 0 : i32
    %c0_i32_0 = arith.constant 0 : i32
    %c0_i32_1 = arith.constant 0 : i32
    return %arg0, %c0_i32, %c0_i32_0 : i32, i32, i32
  }
  func.func @transform_9(%arg0: i32) -> (i32, i32, i32) {
    %c0_i32 = arith.constant 0 : i32
    %c0_i32_0 = arith.constant 0 : i32
    %c0_i32_1 = arith.constant 0 : i32
    return %arg0, %c0_i32, %c0_i32_0 : i32, i32, i32
  }
  func.func @transform_10(%arg0: i32) -> (i32, i32, i32) {
    %c0_i32 = arith.constant 0 : i32
    %c0_i32_0 = arith.constant 0 : i32
    %c0_i32_1 = arith.constant 0 : i32
    return %arg0, %c0_i32, %c0_i32_0 : i32, i32, i32
  }
  func.func @transform_11(%arg0: i32) -> (i32, i32, i32) {
    %c0_i32 = arith.constant 0 : i32
    %c0_i32_0 = arith.constant 0 : i32
    %c0_i32_1 = arith.constant 0 : i32
    return %arg0, %c0_i32, %c0_i32_0 : i32, i32, i32
  }
  func.func @transform_12(%arg0: i32) -> (i32, i32, i32) {
    %c0_i32 = arith.constant 0 : i32
    %c0_i32_0 = arith.constant 0 : i32
    %c0_i32_1 = arith.constant 0 : i32
    return %arg0, %c0_i32, %c0_i32_0 : i32, i32, i32
  }
  func.func @transform_13(%arg0: i32) -> (i32, i32, i32) {
    %c0_i32 = arith.constant 0 : i32
    %c0_i32_0 = arith.constant 0 : i32
    %c0_i32_1 = arith.constant 0 : i32
    return %arg0, %c0_i32, %c0_i32_0 : i32, i32, i32
  }
  func.func @transform_14(%arg0: i32) -> (i32, i32, i32) {
    %c0_i32 = arith.constant 0 : i32
    %c0_i32_0 = arith.constant 0 : i32
    %c0_i32_1 = arith.constant 0 : i32
    return %arg0, %c0_i32, %c0_i32_0 : i32, i32, i32
  }
  func.func @transform_15(%arg0: i32) -> (i32, i32, i32) {
    %c0_i32 = arith.constant 0 : i32
    %c0_i32_0 = arith.constant 0 : i32
    %c0_i32_1 = arith.constant 0 : i32
    return %arg0, %c0_i32, %c0_i32_0 : i32, i32, i32
  }
  func.func @transform_16(%arg0: i32) -> (i32, i32, i32) {
    %c0_i32 = arith.constant 0 : i32
    %c0_i32_0 = arith.constant 0 : i32
    %c0_i32_1 = arith.constant 0 : i32
    return %arg0, %c0_i32, %c0_i32_0 : i32, i32, i32
  }
  func.func @transform_17(%arg0: i32) -> (i32, i32) {
    %c0_i32 = arith.constant 0 : i32
    %c0_i32_0 = arith.constant 0 : i32
    %c0_i32_1 = arith.constant 0 : i32
    return %c0_i32, %c0_i32_0 : i32, i32
  }
  func.func @transform_18(%arg0: i32) -> (i32, i32) {
    %c0_i32 = arith.constant 0 : i32
    %c0_i32_0 = arith.constant 0 : i32
    %c0_i32_1 = arith.constant 0 : i32
    return %c0_i32, %c0_i32_0 : i32, i32
  }
  func.func @transform_19(%arg0: i32) -> (i32, i32) {
    %c0_i32 = arith.constant 0 : i32
    %c0_i32_0 = arith.constant 0 : i32
    %c0_i32_1 = arith.constant 0 : i32
    return %c0_i32, %c0_i32_0 : i32, i32
  }
  func.func @transform_20(%arg0: i32) -> (i32, i32) {
    %c0_i32 = arith.constant 0 : i32
    %c0_i32_0 = arith.constant 0 : i32
    %c0_i32_1 = arith.constant 0 : i32
    return %c0_i32, %c0_i32_0 : i32, i32
  }
}

</mosaic_0001>

<bundles_post_ra>
// kernel: bert_forward.1
= control target key start
LH: loop header
LB: loop body
LE: loop exit
PB: predicated region body
PF: predicated region fallthrough
CT: control target
= control target key end

     0   :  { %s2761_s0 = inlined_call_operand.vmem [shape: f32[16,32], index: 0, kind: input, shape index: {}]   ;;  %s2762_s1 = inlined_call_operand.vmem [shape: f32[2,8], index: 1, kind: input, shape index: {}]   ;;  %s2763_s2 = inlined_call_operand.vmem [shape: f32[16,128], index: 2, kind: input, shape index: {}]   ;;  %s2764_s3 = inlined_call_operand.vmem [shape: f32[1,32], index: 3, kind: input, shape index: {}]   ;;  %s2765_s4 = inlined_call_operand.vmem [shape: f32[1,32], index: 4, kind: input, shape index: {}]   ;;  %s2766_s5 = inlined_call_operand.vmem [shape: bf16[2,32,96], index: 5, kind: input, shape index: {}]   ;;  %s2767_s6 = inlined_call_operand.vmem [shape: f32[2,1,96], index: 6, kind: input, shape index: {}]   ;;  %s2768_s7 = inlined_call_operand.vmem [shape: bf16[2,32,32], index: 7, kind: input, shape index: {}]   ;;  %s2769_s8 = inlined_call_operand.vmem [shape: f32[2,1,32], index: 8, kind: input, shape index: {}]   ;;  %s2770_s9 = inlined_call_operand.vmem [shape: f32[2,1,32], index: 9, kind: input, shape index: {}]   ;;  %s2771_s10 = inlined_call_operand.vmem [shape: f32[2,1,32], index: 10, kind: input, shape index: {}]   ;;  %s2772_s11 = inlined_call_operand.vmem [shape: bf16[2,32,64], index: 11, kind: input, shape index: {}]   ;;  %s2773_s12 = inlined_call_operand.vmem [shape: f32[2,1,64], index: 12, kind: input, shape index: {}]   ;;  %s2774_s13 = inlined_call_operand.vmem [shape: bf16[2,64,32], index: 13, kind: input, shape index: {}]   ;;  %s2775_s14 = inlined_call_operand.vmem [shape: f32[2,1,32], index: 14, kind: input, shape index: {}]   ;;  %s2776_s15 = inlined_call_operand.vmem [shape: f32[2,1,32], index: 15, kind: input, shape index: {}]   ;;  %s2777_s16 = inlined_call_operand.vmem [shape: f32[2,1,32], index: 16, kind: input, shape index: {}]   ;;  %s2778_s17 = inlined_call_operand.vmem [shape: bf16[32,128], index: 17, kind: input, shape index: {}]   ;;  %s2779_s18 = inlined_call_operand.vmem [shape: f32[1,128], index: 18, kind: input, shape index: {}]   ;;  %s2780_s19 = inlined_call_operand.hbm [shape: f32[1,1], index: 19, kind: output, shape index: {0}]   ;;  %s2781_s20 = inlined_call_operand.vmem [shape: f32[16,128], index: 20, kind: output, shape index: {1}]  }
   0x1   :  { %2788 = sst [smem:[#allocation7_spill]] %s2761_s0 }
   0x2   :  { %2789 = sst [smem:[#allocation8_spill]] %s2762_s1 }
   0x3   :  { %2790 = sst [smem:[#allocation9_spill]] %s2763_s2 }
   0x4   :  { %2791 = sst [smem:[#allocation10_spill]] %s2764_s3 }
   0x5   :  { %2792 = sst [smem:[#allocation11_spill]] %s2765_s4 }
   0x6   :  { %2793 = sst [smem:[#allocation12_spill]] %s2766_s5 }
   0x7   :  { %2794 = sst [smem:[#allocation13_spill]] %s2768_s7 }
   0x8   :  { %2795 = sst [smem:[#allocation14_spill]] %s2778_s17 }
   0x9   :  { %2796 = sst [smem:[#allocation15_spill]] %s2779_s18 }
   0xa   :  { %2797 = sst [smem:[#allocation16_spill]] %s2780_s19 }
   0xb   :  { %2798 = sst [smem:[#allocation17_spill]] %s2781_s20 }
   0xc   :  { %26 = vsyncpa [#allocation4], 0  ;;  %s2457_s1 = smov 0  }
   0xd LB: > { %2799 = sst [smem:[#allocation6_spill]] %s2337_s1  ;;  %s2463_s22 = sadd.s32 4294967295, %s2337_s1   ;;  %s2337_s1 = sphi %s2457_s1, %s32_s1  }
   0xe   : > { %p2042_p0 = scmp.ge.s32.totalorder %s2337_s1, 1  ;;  %p650_p1 = scmp.lt.s32.totalorder %s2337_s1, 3 }
  0x10   : > { %p651_p2 = pnand %p2042_p0, %p650_p1 }
  0x11   : > { %p742_p3 = scmp.lt.s32.totalorder (!%p651_p2), %s2463_s22, 1  ;;  %s2800_s5 = sld [smem:[#allocation12_spill]] (!%p651_p2) }
  0x12   : > { %654 = sbr.rel (%p651_p2) target bundleno = 4246 (0x1096), region = 96  ;;  %s2801_s7 = sld [smem:[#allocation13_spill]] (!%p651_p2) }
  0x13   : > { %p2051_p4 = scmp.ne.s32.totalorder (!%p651_p2), %s2463_s22, 0 }
  0x19   : > { %s2469_s23 = scalar_select %p742_p3, %s2463_s22, 1 }
  0x1a   : > { %790 = sbr.rel (%p2051_p4) target bundleno = 351 (0x15f), region = 100  ;;  %s2802_s0 = sld [smem:[#allocation7_spill]] (!%p2051_p4)  ;;  %vm795_vm0 = vcmask (!%p2051_p4), 261120  }
  0x1b   : > { %s2094_s24 = sshll.u32 %s2469_s23, 4  ;;  %s2097_s17 = sshll.u32 %s2469_s23, 5 }
  0x1c   : > { %s2479_s28 = scalar_lea.vmem %s2800_s5, %s2094_s24  ;;  %s2484_s30 = scalar_lea.vmem %s2801_s7, %s2094_s24 }
  0x1d   : > { %s2501_s5 = scalar_lea.vmem %s2772_s11, %s2094_s24  ;;  %s771_s7 = scalar_lea.vmem %s2773_s12, %s2469_s23 }
  0x1e   : > { %s2511_s1 = scalar_lea.vmem %s2774_s13, %s2097_s17  ;;  %s779_s2 = scalar_lea.vmem %s2775_s14, %s2469_s23 }
  0x1f   : > { %s782_s26 = scalar_lea.vmem %s2776_s15, %s2469_s23  ;;  %s785_s18 = scalar_lea.vmem %s2777_s16, %s2469_s23 }
  0x20   : > { %v791_v0 = vld [vmem:[%s2802_s0] sm:$0xff] (!%p2051_p4)  ;;  %v792_v1 = vld [vmem:[%s2802_s0 + $0x8] sm:$0xff] (!%p2051_p4)  ;;  %s2803_s20 = sld [smem:[#allocation10_spill]] (!%p2051_p4)  ;;  %s2804_s27 = sld [smem:[#allocation11_spill]] (!%p2051_p4) }
  0x21   : > { %v796_v2 = vsel %vm795_vm0, %v791_v0, 0.0  ;;  %v799_v3 = vsel %vm795_vm0, %v792_v1, 0.0 }
  0x22   : > { %797 = vadd.xlane.f32.xlu0 %v796_v2 }
  0x26   : > { %800 = vadd.xlane.f32.xlu0 %v799_v3  ;;  %v2052_v21 = vld [vmem:[%s2803_s20] ss:$0 sm:$0xff] }
  0x27   : > { %v2053_v23 = vld [vmem:[%s2804_s27] ss:$0 sm:$0xff] }
  0xaf   : > { %v798_v4 = vpop.xlane.xlu0 %797 }
  0xb0   : > { %v803_v5 = vmul.f32 0.03125, %v798_v4 }
  0xb2   : > { %v805_v6 = vsub.f32 %v791_v0, %v803_v5 }
  0xb3   : > { %v801_v7 = vpop.xlane.xlu0 %800 }
  0xb4   : > { %v804_v8 = vmul.f32 0.03125, %v801_v7  ;;  %v807_v9 = vmul.f32 %v805_v6, %v805_v6 }
  0xb6   : > { %v806_v10 = vsub.f32 %v792_v1, %v804_v8  ;;  %v809_v11 = vsel %vm795_vm0, %v807_v9, 0.0 }
  0xb7   : > { %810 = vadd.xlane.f32.xlu1 %v809_v11 }
  0xb8   : > { %v808_v12 = vmul.f32 %v806_v10, %v806_v10 }
  0xba   : > { %v812_v13 = vsel %vm795_vm0, %v808_v12, 0.0 }
  0xbb   : > { %813 = vadd.xlane.f32.xlu1 %v812_v13 }
 0x144   : > { %v811_v14 = vpop.xlane.xlu1 %810 }
 0x145   : > { %v815_v15 = vmul.f32 0.03125, %v811_v14 }
 0x147   : > { %v817_v16 = vadd.f32 1e-12, %v815_v15 }
 0x148   : > { %v814_v17 = vpop.xlane.xlu1 %813 }
 0x149   : > { %2256 = vrsqrt.f32 %v817_v16  ;;  %v816_v18 = vmul.f32 0.03125, %v814_v17 }
 0x14b   : > { %v818_v19 = vadd.f32 1e-12, %v816_v18 }
 0x14d   : > { %2258 = vrsqrt.f32 %v818_v19 }
 0x153   : > { %v2257_v20 = vpop.eup %2256 }
 0x154   : > { %v821_v22 = vmul.f32 %v2257_v20, %v805_v6 }
 0x156   : > { %v829_v24 = vmul.f32 %v2052_v21, %v821_v22 }
 0x157   : > { %v2259_v25 = vpop.eup %2258 }
 0x158   : > { %v837_v26 = vadd.f32 %v2053_v23, %v829_v24  ;;  %v822_v27 = vmul.f32 %v2259_v25, %v806_v10 }
 0x15a   : > { %839 = vst.msk [vmem:[#allocation2] sm:$0xff] %vm795_vm0, %v837_v26  ;;  %v830_v28 = vmul.f32 %v2052_v21, %v822_v27 }
 0x15c   : > { %v838_v29 = vadd.f32 %v2053_v23, %v830_v28 }
 0x15e   : > { %840 = vst.msk [vmem:[#allocation2 + $0x8] sm:$0xff] %vm795_vm0, %v838_v29 }
 0x15f PF: > { %v2265_v30 = vld [vmem:[%s2479_s28] sm:$0xff]   ;;  %v2339_v31 = vmov 0.0   ;;  %v2266_v32 = vld [vmem:[%s2479_s28 + $0x8] sm:$0xff]   ;;  %vm2340_vm1 = vmmov 0   ;;  %vm891_vm2 = vcmask 261120   ;;  %s2805_s29 = scalar_lea.vmem %s2767_s6, %s2469_s23  ;;  %s2341_s17 = smov 96   ;;  %v856_v51 = vlaneseq }
 0x160   : > { %2131 = vmatprep.subr.bf16.mxu0 %v2339_v31  ;;  %2139 = vmatprep.subr.bf16.mxu1 %v2339_v31  ;;  %v2055_v36 = vld [vmem:[%s2805_s29] ss:$0 sm:$0xff]  ;;  %vm951_vm3 = vcmask 130048   ;;  %v2342_v49 = vmov 1966171168   ;;  %s2806_s19 = sld [smem:[#allocation8_spill]]  ;;  %s2807_s29 = scalar_lea.vmem %s2769_s8, %s2469_s23 }
 0x161   : > { %2132 = vmatpush3.bf16.msra.mxu0 %v2265_v30  ;;  %2135 = vmatprep.mubr.msk.bf16.mxu0 %vm2340_vm1, %v2339_v31  ;;  %v2550_v33 = vld [vmem:[#allocation2] sm:$0xff]  ;;  %v854_v50 = vunpack.c.l.s4 %v2342_v49  ;;  %v857_v53 = vshrl.u32 %v856_v51, 7  ;;  %vm1047_vm4 = vcmask 64512   ;;  %s2343_s20 = smov 64   ;;  %s2344_s25 = smov 80   ;;  %vm1077_vm5 = vcmask 1043456  }
 0x162   : > { %2133 = vmatprep.subr.bf16.mxu0 %v2339_v31  ;;  %2141 = vmatprep.mubr.msk.bf16.mxu1 %vm2340_vm1, %v2339_v31  ;;  %s2345_s24 = smov 112   ;;  %s2346_s27 = smov 48   ;;  %vm1640_vm6 = vcmask 523264  }
 0x163   : > { %v855_v52 = vunpack.c.0.s8 %v854_v50  ;;  %v940_v57 = vsub.s32 0, %v857_v53  ;;  %s2347_s28 = smov 16   ;;  %s2808_s3 = scalar_lea.vmem %s2770_s9, %s2469_s23 }
 0x164   : > { %p2085_p5 = scmp.ne.s32.totalorder %s2463_s22, 1 }
 0x165   : > { %v2552_v34 = vld [vmem:[#allocation2 + $0x8] sm:$0xff]  ;;  %2134 = vmatpush3.bf16.msra.mxu0 %v2266_v32  ;;  %v858_v54 = vsub.s32 %v855_v52, %v857_v53  ;;  %vm2349_vm7 = vmmov (!%p2085_p5), 0   ;;  %vm1848_vm9 = vcmask (!%p2085_p5), 7168   ;;  %s2350_s4 = smov (!%p2085_p5), 1.0  }
 0x166   : > { %v867_v35 = vpack.c.bf16 %v2552_v34, %v2550_v33  ;;  %2145 = vmatprep.subr.bf16.mxu0 %v2339_v31  ;;  %v2054_v55 = vld.sshfl [vmem:[%s2806_s19] sm:$0x11 pattern:$0x75316420] }
 0x167   : > { %v859_v56 = vrot.slane %v2054_v55, %v858_v54  ;;  %v852_v58 = vcombine.high %v2054_v55, %v2054_v55 }
 0x168   : > { %2136 = vmatmul.mubr.msk.bf16.vlgmr.msra.gmra.mrb[0].mxu0 %vm891_vm2, %v867_v35 }
 0x169   : > { %2147 = vmatprep.mubr.msk.bf16.mxu0 %vm2340_vm1, %v2339_v31  ;;  %v2590_v59 = vrot.slane %v859_v56, %v940_v57  ;;  %v866_v60 = vrot.slane %v852_v58, %v858_v54 }
 0x16b   : > { %v2593_v0 = vrot.slane %v866_v60, %v940_v57 }
 0x23b   : > { %v929_v37 = vpop.f32.mrb[0].mxu0 }
 0x23c   : > { %v930_v38 = vadd.f32 %v2055_v36, %v929_v37  ;;  %v2137_v39 = vpop.f32.mrb[1].mxu0 }
 0x23d   : > { %v932_v40 = vpop.f32.mrb[2].mxu0 }
 0x23e   : > { %v2568_v41 = vpack.c.bf16 %v930_v38, %v930_v38  ;;  %v933_v42 = vadd.f32 %v2055_v36, %v932_v40  ;;  %v2138_v43 = vpop.f32.mrb[3].mxu0 }
 0x240   : > { %949 = vrot.lane.b32.xlu0 %v2568_v41, %s2341_s17  ;;  %v2571_v44 = vpack.c.bf16 %v933_v42, %v933_v42 }
 0x244   : > { %999 = vrot.lane.b32.xlu0 %v2571_v44, %s2341_s17 }
 0x2b2   : > { %v950_v45 = vpop.permute.xlu0 %949 }
 0x2b3   : > { %v956_v46 = vsel %vm951_vm3, %v950_v45, 0 }
 0x2b4   : > { %2140 = vmatpush3.bf16.xpose.msra.mxu1 %v956_v46 }
 0x2b5   : > { %2151 = vmatprep.subr.bf16.mxu1 %v2339_v31 }
 0x2b6   : > { %v1000_v47 = vpop.permute.xlu0 %999 }
 0x2b7   : > { %v1005_v48 = vsel %vm951_vm3, %v1000_v47, 0 }
 0x2b8   : > { %2146 = vmatpush3.bf16.xpose.msra.mxu0 %v1005_v48 }
 0x2b9   : > { %2157 = vmatprep.subr.bf16.mxu0 %v2339_v31 }
 0x2bb   : > { %2142 = vmatmul.mubr.msk.bf16.vlgmr.msra.gmra.mrb[0].mxu1 %vm951_vm3, %v2568_v41 }
 0x2bc   : > { %2153 = vmatprep.mubr.msk.bf16.mxu1 %vm2340_vm1, %v2339_v31 }
 0x2bf   : > { %2148 = vmatmul.mubr.msk.bf16.vlgmr.msra.gmra.mrb[4].mxu0 %vm951_vm3, %v2571_v44 }
 0x2c0   : > { %2159 = vmatprep.mubr.msk.bf16.mxu0 %vm2340_vm1, %v2339_v31 }
 0x38e   : > { %v992_v61 = vpop.f32.mrb[0].mxu1 }
 0x38f   : > { %v993_v62 = vadd.f32 %v992_v61, %v2590_v59  ;;  %v2143_v63 = vpop.f32.mrb[1].mxu1 }
 0x390   : > { %v995_v1 = vpop.f32.mrb[2].mxu1 }
 0x391   : > { %v2144_v2 = vpop.f32.mrb[3].mxu1  ;;  %v1048_v3 = vsel %vm1047_vm4, %v993_v62, -inf }
 0x392   : > { %1049 = vmax.xlane.f32.xlu1 %v1048_v3  ;;  %v1041_v4 = vpop.f32.mrb[4].mxu0 }
 0x393   : > { %v1042_v5 = vadd.f32 %v1041_v4, %v2593_v0  ;;  %v2149_v6 = vpop.f32.mrb[5].mxu0 }
 0x394   : > { %v1044_v7 = vpop.f32.mrb[6].mxu0 }
 0x395   : > { %v2150_v8 = vpop.f32.mrb[7].mxu0  ;;  %v1051_v9 = vsel %vm1047_vm4, %v1042_v5, -inf }
 0x396   : > { %1052 = vmax.xlane.f32.xlu1 %v1051_v9 }
 0x3a7   : > { %1072 = vrot.lane.b32.xlu1 %v2568_v41, %s2343_s20 }
 0x3ab   : > { %1121 = vrot.lane.b32.xlu1 %v2571_v44, %s2343_s20  ;;  %s2809_s20 = scalar_lea.vmem %s2771_s10, %s2469_s23 }
 0x3af   : > { %1171 = vrot.lane.b32.xlu1 %v2568_v41, %s2344_s25 }
 0x41f   : > { %v1050_v10 = vpop.xlane.xlu1 %1049 }
 0x420   : > { %v1054_v11 = vsub.f32 %v993_v62, %v1050_v10 }
 0x422   : > { %v1056_v12 = vmul.f32 1.442695, %v1054_v11 }
 0x423   : > { %v1053_v13 = vpop.xlane.xlu1 %1052 }
 0x424   : > { %2275 = vpow2.f32 %v1056_v12  ;;  %v1055_v14 = vsub.f32 %v1042_v5, %v1053_v13 }
 0x426   : > { %v1058_v15 = vmul.f32 1.442695, %v1055_v14 }
 0x427   : > { %v1073_v16 = vpop.permute.xlu1 %1072 }
 0x428   : > { %2277 = vpow2.f32 %v1058_v15  ;;  %v1079_v17 = vsel %vm1077_vm5, %v1073_v16, 0 }
 0x429   : > { %2152 = vmatpush3.bf16.msra.mxu1 %v1079_v17 }
 0x42a   : > { %2163 = vmatprep.subr.bf16.mxu1 %v2339_v31 }
 0x42b   : > { %v1122_v18 = vpop.permute.xlu1 %1121 }
 0x42c   : > { %v1127_v19 = vsel %vm1077_vm5, %v1122_v18, 0 }
 0x42d   : > { %2158 = vmatpush3.bf16.msra.mxu0 %v1127_v19 }
 0x42e   : > { %v2276_v20 = vpop.eup %2275  ;;  %2169 = vmatprep.subr.bf16.mxu0 %v2339_v31 }
 0x42f   : > { %v1060_v21 = vsel %vm1047_vm4, %v2276_v20, 0.0  ;;  %v1172_v24 = vpop.permute.xlu1 %1171 }
 0x430   : > { %1061 = vadd.xlane.f32.xlu0 %v1060_v21  ;;  %v1177_v32 = vsel %vm951_vm3, %v1172_v24, 0  ;;  %v2268_v21 = vld [vmem:[%s2484_s30 + $0x8] sm:$0xff]  }
 0x432   : > { %v2278_v22 = vpop.eup %2277 }
 0x433   : > { %v1063_v23 = vsel %vm1047_vm4, %v2278_v22, 0.0 }
 0x434   : > { %1064 = vadd.xlane.f32.xlu1 %v1063_v23 }
 0x445   : > { %1221 = vrot.lane.b32.xlu1 %v2571_v44, %s2344_s25 }
 0x446   : > { %1169 = vrot.lane.b32.xlu0 %v2568_v41, %s2345_s24 }
 0x449   : > { %1219 = vrot.lane.b32.xlu1 %v2571_v44, %s2345_s24 }
 0x4bd   : > { %v1062_v25 = vpop.xlane.xlu0 %1061 }
 0x4be   : > { %2279 = vrcp.f32 %v1062_v25 }
 0x4c1   : > { %v1065_v26 = vpop.xlane.xlu1 %1064  ;;  %v1170_v39 = vpop.permute.xlu0 %1169 }
 0x4c2   : > { %2281 = vrcp.f32 %v1065_v26 }
 0x4c5   : > { %v1222_v36 = vpop.permute.xlu1 %1221 }
 0x4c6   : > { %v1227_v38 = vsel %vm951_vm3, %v1222_v36, 0 }
 0x4c8   : > { %v2280_v27 = vpop.eup %2279 }
 0x4c9   : > { %v1067_v28 = vmul.f32 %v2280_v27, %v2276_v20  ;;  %v1220_v40 = vpop.permute.xlu1 %1219  ;;  %v2267_v20 = vld [vmem:[%s2484_s30] sm:$0xff]  }
 0x4cb   : > { %v1070_v29 = vpack.c.bf16 %v1067_v28, %v1067_v28 }
 0x4cc   : > { %v2282_v30 = vpop.eup %2281 }
 0x4cd   : > { %v1069_v35 = vmul.f32 %v2282_v30, %v2278_v22  ;;  %2154 = vmatmul.mubr.msk.bf16.vlgmr.msra.gmra.mrb[4].mxu1 %vm1047_vm4, %v1070_v29 }
 0x4ce   : > { %2164 = vmatpush3.bf16.xpose.msra.mxu1 %v1177_v32  ;;  %2165 = vmatprep.mubr.msk.bf16.mxu1 %vm2340_vm1, %v2339_v31 }
 0x4cf   : > { %v1071_v37 = vpack.c.bf16 %v1069_v35, %v1069_v35  ;;  %2175 = vmatprep.subr.bf16.mxu1 %v2339_v31 }
 0x4d1   : > { %2160 = vmatmul.mubr.msk.bf16.vlgmr.msra.gmra.mrb[8].mxu0 %vm1047_vm4, %v1071_v37 }
 0x4d2   : > { %2170 = vmatpush3.bf16.xpose.msra.mxu0 %v1227_v38  ;;  %2171 = vmatprep.mubr.msk.bf16.mxu0 %vm2340_vm1, %v2339_v31 }
 0x4d3   : > { %2181 = vmatprep.subr.bf16.mxu0 %v2339_v31 }
 0x4d5   : > { %2166 = vmatmul.mubr.msk.bf16.vlgmr.msra.gmra.mrb[8].mxu1 %vm951_vm3, %v1170_v39 }
 0x4d6   : > { %2177 = vmatprep.mubr.msk.bf16.mxu1 %vm2340_vm1, %v2339_v31 }
 0x4d9   : > { %2172 = vmatmul.mubr.msk.bf16.vlgmr.msra.gmra.mrb[12].mxu0 %vm951_vm3, %v1220_v40  ;;  %v2067_v40 = vld [vmem:[%s2807_s29] ss:$0 sm:$0xff]  ;;  %s2810_s29 = sld [smem:[#allocation14_spill]] (!%p2085_p5) }
 0x4da   : > { %2183 = vmatprep.mubr.msk.bf16.mxu0 %vm2340_vm1, %v2339_v31 }
 0x5a0   : > { %v2626_v42 = vpop.f32.mrb[4].mxu1 }
 0x5a1   : > { %v2155_v43 = vpop.f32.mrb[5].mxu1 }
 0x5a2   : > { %v1118_v45 = vpop.f32.mrb[6].mxu1 }
 0x5a3   : > { %v2156_v46 = vpop.f32.mrb[7].mxu1 }
 0x5a4   : > { %v2628_v47 = vpop.f32.mrb[8].mxu0 }
 0x5a5   : > { %v2161_v48 = vpop.f32.mrb[9].mxu0 }
 0x5a6   : > { %v1166_v49 = vpop.f32.mrb[10].mxu0 }
 0x5a7   : > { %v2162_v50 = vpop.f32.mrb[11].mxu0 }
 0x5a8   : > { %v1213_v52 = vpop.f32.mrb[8].mxu1 }
 0x5a9   : > { %v1214_v53 = vadd.f32 %v1213_v52, %v2590_v59  ;;  %v2167_v54 = vpop.f32.mrb[9].mxu1 }
 0x5aa   : > { %v1216_v55 = vpop.f32.mrb[10].mxu1 }
 0x5ab   : > { %v2168_v56 = vpop.f32.mrb[11].mxu1  ;;  %v1269_v57 = vsel %vm1047_vm4, %v1214_v53, -inf }
 0x5ac   : > { %1270 = vmax.xlane.f32.xlu1 %v1269_v57  ;;  %v1263_v58 = vpop.f32.mrb[12].mxu0 }
 0x5ad   : > { %v1264_v60 = vadd.f32 %v1263_v58, %v2593_v0  ;;  %v2173_v61 = vpop.f32.mrb[13].mxu0 }
 0x5ae   : > { %v1266_v62 = vpop.f32.mrb[14].mxu0 }
 0x5af   : > { %v2174_v63 = vpop.f32.mrb[15].mxu0  ;;  %v1272_v1 = vsel %vm1047_vm4, %v1264_v60, -inf }
 0x5b0   : > { %1273 = vmax.xlane.f32.xlu0 %v1272_v1  ;;  %v2270_v1 = vld [vmem:[%s2501_s5 + $0x8] sm:$0xff]  }
 0x5c6   : > { %1341 = vrot.lane.b32.xlu0 %v2571_v44, %s2346_s27 }
 0x639   : > { %v1271_v2 = vpop.xlane.xlu1 %1270 }
 0x63a   : > { %v1275_v59 = vsub.f32 %v1214_v53, %v1271_v2 }
 0x63c   : > { %v1277_v3 = vmul.f32 1.442695, %v1275_v59 }
 0x63d   : > { %v1274_v4 = vpop.xlane.xlu0 %1273 }
 0x63e   : > { %2283 = vpow2.f32 %v1277_v3  ;;  %v1276_v5 = vsub.f32 %v1264_v60, %v1274_v4 }
 0x640   : > { %v1279_v6 = vmul.f32 1.442695, %v1276_v5 }
 0x641   : > { %v1342_v7 = vpop.permute.xlu0 %1341 }
 0x642   : > { %2285 = vpow2.f32 %v1279_v6  ;;  %v1347_v0 = vsel %vm1077_vm5, %v1342_v7, 0 }
 0x643   : > { %2182 = vmatpush3.bf16.msra.mxu0 %v1347_v0  ;;  %v2071_v0 = vld [vmem:[%s2808_s3] ss:$0 sm:$0xff]  ;;  %s2811_s3 = sld [smem:[#allocation15_spill]] (!%p2085_p5) }
 0x644   : > { %2195 = vmatprep.subr.bf16.mxu0 %v2339_v31 }
 0x648   : > { %v2284_v8 = vpop.eup %2283 }
 0x649   : > { %v1281_v9 = vsel %vm1047_vm4, %v2284_v8, 0.0 }
 0x64a   : > { %1282 = vadd.xlane.f32.xlu1 %v1281_v9 }
 0x64c   : > { %v2286_v10 = vpop.eup %2285 }
 0x64d   : > { %v1284_v44 = vsel %vm1047_vm4, %v2286_v10, 0.0 }
 0x64e   : > { %1285 = vadd.xlane.f32.xlu1 %v1284_v44 }
 0x65f   : > { %1293 = vrot.lane.b32.xlu1 %v2568_v41, %s2346_s27 }
 0x6d7   : > { %v1283_v11 = vpop.xlane.xlu1 %1282 }
 0x6d8   : > { %2287 = vrcp.f32 %v1283_v11  ;;  %v2072_v11 = vld [vmem:[%s2809_s20] ss:$0 sm:$0xff]  ;;  %s2812_s20 = sld [smem:[#allocation17_spill]] (!%p2085_p5) }
 0x6db   : > { %v1286_v12 = vpop.xlane.xlu1 %1285 }
 0x6dc   : > { %2289 = vrcp.f32 %v1286_v12 }
 0x6df   : > { %v1294_v13 = vpop.permute.xlu1 %1293 }
 0x6e0   : > { %v1299_v14 = vsel %vm1077_vm5, %v1294_v13, 0 }
 0x6e1   : > { %2176 = vmatpush3.bf16.msra.mxu1 %v1299_v14 }
 0x6e2   : > { %v2288_v15 = vpop.eup %2287  ;;  %2187 = vmatprep.subr.bf16.mxu1 %v2339_v31 }
 0x6e3   : > { %v1288_v16 = vmul.f32 %v2288_v15, %v2284_v8 }
 0x6e5   : > { %v1291_v17 = vpack.c.bf16 %v1288_v16, %v1288_v16  ;;  %v2271_v16 = vld [vmem:[%s2511_s1] sm:$0xff]  }
 0x6e6   : > { %v2290_v18 = vpop.eup %2289 }
 0x6e7   : > { %v1290_v19 = vmul.f32 %v2290_v18, %v2286_v10  ;;  %2178 = vmatmul.mubr.msk.bf16.vlgmr.msra.gmra.mrb[12].mxu1 %vm1047_vm4, %v1291_v17  ;;  %v2272_v17 = vld [vmem:[%s2511_s1 + $0x8] sm:$0xff]   ;;  %v2273_v18 = vld [vmem:[%s2511_s1 + $0x10] sm:$0xff]  }
 0x6e8   : > { %2191 = vmatprep.mubr.msk.bf16.mxu1 %vm2340_vm1, %v2339_v31  ;;  %2188 = vmatpush3.bf16.msra.mxu1 %v2267_v20 }
 0x6e9   : > { %v1292_v41 = vpack.c.bf16 %v1290_v19, %v1290_v19  ;;  %2189 = vmatprep.subr.bf16.mxu1 %v2339_v31  ;;  %v2274_v19 = vld [vmem:[%s2511_s1 + $0x18] sm:$0xff]  }
 0x6eb   : > { %2184 = vmatmul.mubr.msk.bf16.vlgmr.msra.gmra.mrb[16].mxu0 %vm1047_vm4, %v1292_v41  ;;  %v2073_v41 = vld [vmem:[%s771_s7] ss:$0 sm:$0xff] }
 0x6ec   : > { %2199 = vmatprep.mubr.msk.bf16.mxu0 %vm2340_vm1, %v2339_v31  ;;  %2190 = vmatpush3.bf16.msra.mxu1 %v2268_v21 }
 0x6ed   : > { %2203 = vmatprep.subr.bf16.mxu1 %v2339_v31 }
 0x7ba   : > { %v1335_v22 = vpop.f32.mrb[12].mxu1 }
 0x7bb   : > { %v2179_v23 = vpop.f32.mrb[13].mxu1 }
 0x7bc   : > { %v1338_v24 = vpop.f32.mrb[14].mxu1 }
 0x7bd   : > { %v2180_v25 = vpop.f32.mrb[15].mxu1 }
 0x7be   : > { %v1383_v26 = vpop.f32.mrb[16].mxu0 }
 0x7bf   : > { %v2260_v27 = vpack.i.bf16 %v1383_v26, %v1335_v22  ;;  %v2185_v28 = vpop.f32.mrb[17].mxu0 }
 0x7c0   : > { %v1386_v29 = vpop.f32.mrb[18].mxu0 }
 0x7c1   : > { %2261 = vrot.lane.b32.xlu1 %v2260_v27, %s2347_s28  ;;  %v2186_v30 = vpop.f32.mrb[19].mxu0 }
 0x833   : > { %v2262_v32 = vpop.permute.xlu1 %2261 }
 0x834   : > { %v2264_v35 = vunpack.i.h.bf16 %v2262_v32  ;;  %v2263_v36 = vunpack.i.l.bf16 %v2262_v32 }
 0x836   : > { %v1398_v37 = vsel %vm951_vm3, %v2628_v47, %v2264_v35  ;;  %v1397_v38 = vsel %vm951_vm3, %v2626_v42, %v2263_v36 }
 0x837   : > { %v1399_v39 = vpack.c.bf16 %v1398_v37, %v1397_v38 }
 0x839   : > { %2192 = vmatmul.mubr.msk.bf16.vlgmr.msra.gmra.mrb[16].mxu1 %vm891_vm2, %v1399_v39 }
 0x83a   : > { %2211 = vmatprep.mubr.msk.bf16.mxu1 %vm2340_vm1, %v2339_v31  ;;  %2204 = vmatpush3.bf16.msra.mxu1 %v2271_v16 }
 0x83b   : > { %2205 = vmatprep.subr.bf16.mxu1 %v2339_v31 }
 0x83e   : > { %2206 = vmatpush3.bf16.msra.mxu1 %v2272_v17 }
 0x83f   : > { %2207 = vmatprep.subr.bf16.mxu1 %v2339_v31 }
 0x842   : > { %2208 = vmatpush3.bf16.msra.mxu1 %v2273_v18 }
 0x843   : > { %2209 = vmatprep.subr.bf16.mxu1 %v2339_v31 }
 0x846   : > { %2210 = vmatpush3.bf16.msra.mxu1 %v2274_v19 }
 0x90c   : > { %v1460_v43 = vpop.f32.mrb[16].mxu1 }
 0x90d   : > { %v1461_v45 = vadd.f32 %v2067_v40, %v1460_v43  ;;  %v2193_v46 = vpop.f32.mrb[17].mxu1 }
 0x90e   : > { %v1463_v48 = vpop.f32.mrb[18].mxu1 }
 0x90f   : > { %v1464_v49 = vadd.f32 %v2067_v40, %v1463_v48  ;;  %v2194_v47 = vpop.f32.mrb[19].mxu1  ;;  %v1467_v50 = vadd.f32 %v1461_v45, %v2550_v33 }
 0x911   : > { %v1471_v42 = vsel %vm891_vm2, %v1467_v50, 0.0  ;;  %v1468_v52 = vadd.f32 %v1464_v49, %v2552_v34  ;;  %v2269_v34 = vld [vmem:[%s2501_s5] sm:$0xff]  }
 0x912   : > { %1472 = vadd.xlane.f32.xlu1 %v1471_v42  ;;  %2196 = vmatpush3.bf16.msra.mxu0 %v2269_v34 }
 0x913   : > { %v1474_v53 = vsel %vm891_vm2, %v1468_v52, 0.0  ;;  %2197 = vmatprep.subr.bf16.mxu0 %v2339_v31 }
 0x914   : > { %1475 = vadd.xlane.f32.xlu0 %v1474_v53 }
 0x916   : > { %2198 = vmatpush3.bf16.msra.mxu0 %v2270_v1 }
 0x99f   : > { %v1473_v54 = vpop.xlane.xlu1 %1472 }
 0x9a0   : > { %v1478_v55 = vmul.f32 0.03125, %v1473_v54 }
 0x9a1   : > { %v1476_v56 = vpop.xlane.xlu0 %1475 }
 0x9a2   : > { %v1480_v57 = vsub.f32 %v1467_v50, %v1478_v55  ;;  %v1479_v58 = vmul.f32 0.03125, %v1476_v56  ;;  %v2077_v50 = vld [vmem:[%s779_s2] ss:$0 sm:$0xff]  ;;  %s2813_s2 = sld [smem:[#allocation9_spill]] (!%p2085_p5) }
 0x9a4   : > { %v1481_v60 = vsub.f32 %v1468_v52, %v1479_v58  ;;  %v1482_v61 = vmul.f32 %v1480_v57, %v1480_v57 }
 0x9a6   : > { %v1484_v62 = vsel %vm891_vm2, %v1482_v61, 0.0  ;;  %v1483_v33 = vmul.f32 %v1481_v60, %v1481_v60 }
 0x9a7   : > { %1485 = vadd.xlane.f32.xlu0 %v1484_v62 }
 0x9a8   : > { %v1487_v63 = vsel %vm891_vm2, %v1483_v33, 0.0 }
 0x9a9   : > { %1488 = vadd.xlane.f32.xlu1 %v1487_v63 }
 0xa34   : > { %v1486_v2 = vpop.xlane.xlu0 %1485 }
 0xa35   : > { %v1490_v59 = vmul.f32 0.03125, %v1486_v2 }
 0xa36   : > { %v1489_v3 = vpop.xlane.xlu1 %1488 }
 0xa37   : > { %v1492_v4 = vadd.f32 1e-12, %v1490_v59  ;;  %v1491_v5 = vmul.f32 0.03125, %v1489_v3 }
 0xa39   : > { %2291 = vrsqrt.f32 %v1492_v4  ;;  %v1493_v6 = vadd.f32 1e-12, %v1491_v5 }
 0xa3b   : > { %2293 = vrsqrt.f32 %v1493_v6 }
 0xa43   : > { %v2292_v7 = vpop.eup %2291 }
 0xa44   : > { %v1496_v8 = vmul.f32 %v2292_v7, %v1480_v57 }
 0xa45   : > { %v2294_v9 = vpop.eup %2293 }
 0xa46   : > { %v1504_v10 = vmul.f32 %v2071_v0, %v1496_v8  ;;  %v1497_v44 = vmul.f32 %v2294_v9, %v1481_v60 }
 0xa48   : > { %v1505_v12 = vmul.f32 %v2071_v0, %v1497_v44  ;;  %v1512_v13 = vadd.f32 %v2072_v11, %v1504_v10 }
 0xa4a   : > { %v1513_v14 = vadd.f32 %v2072_v11, %v1505_v12  ;;  %v2083_v11 = vld [vmem:[%s782_s26] ss:$0 sm:$0xff] }
 0xa4c   : > { %v1514_v15 = vpack.c.bf16 %v1513_v14, %v1512_v13 }
 0xa4e   : > { %2200 = vmatmul.mubr.msk.bf16.vlgmr.msra.gmra.mrb[20].mxu0 %vm891_vm2, %v1514_v15 }
 0xb21   : > { %v1575_v20 = vpop.f32.mrb[20].mxu0 }
 0xb22   : > { %v1576_v21 = vadd.f32 %v2073_v41, %v1575_v20  ;;  %v2201_v22 = vpop.f32.mrb[21].mxu0  ;;  %v2348_v20 = vmov (!%p2085_p5), 0.0  }
 0xb23   : > { %v1578_v23 = vpop.f32.mrb[22].mxu0  ;;  %2215 = vmatprep.subr.bf16.mxu0 (!%p2085_p5), %v2348_v20  ;;  %2219 = vmatprep.mubr.msk.bf16.mxu0 (!%p2085_p5), %vm2349_vm7, %v2348_v20 }
 0xb24   : > { %v1584_v24 = vmul.f32 0.044715, %v1576_v21  ;;  %v1579_v25 = vadd.f32 %v2073_v41, %v1578_v23  ;;  %v2202_v26 = vpop.f32.mrb[23].mxu0  ;;  %v1582_v43 = vmul.f32 0.5, %v1576_v21  ;;  %v2303_v41 = vld [vmem:[%s2810_s29] sm:$0xff] (!%p2085_p5)   ;;  %v1810_v23 = vand.u32 (!%p2085_p5), 127, %v856_v51 }
 0xb25   : > { %2216 = vmatpush3.bf16.msra.mxu0 (!%p2085_p5), %v2303_v41 }
 0xb26   : > { %v1586_v27 = vmul.f32 %v1584_v24, %v1576_v21  ;;  %v1585_v28 = vmul.f32 0.044715, %v1579_v25  ;;  %v1583_v45 = vmul.f32 0.5, %v1579_v25  ;;  %2217 = vmatprep.subr.bf16.mxu0 (!%p2085_p5), %v2348_v20  ;;  %v2086_v24 = vld [vmem:[%s2811_s3] ss:$0 sm:$0xff] (!%p2085_p5)  ;;  %vm1811_vm8 = vcmp.lt.s32.totalorder (!%p2085_p5), %v1810_v23, 3 }
 0xb28   : > { %v1588_v29 = vmul.f32 %v1586_v27, %v1576_v21  ;;  %v1587_v30 = vmul.f32 %v1585_v28, %v1579_v25 }
 0xb2a   : > { %v1590_v32 = vadd.f32 %v1588_v29, %v1576_v21  ;;  %v1589_v35 = vmul.f32 %v1587_v30, %v1579_v25  ;;  %v2304_v21 = vld [vmem:[%s2810_s29 + $0x8] sm:$0xff] (!%p2085_p5)  }
 0xb2b   : > { %2218 = vmatpush3.bf16.msra.mxu0 (!%p2085_p5), %v2304_v21 }
 0xb2c   : > { %v1592_v31 = vmul.f32 0.7978846, %v1590_v32  ;;  %v1591_v36 = vadd.f32 %v1589_v35, %v1579_v25  ;;  %v1807_v35 = vld [vmem:[%s2813_s2] sm:$0xff] (!%p2085_p5) }
 0xb2e   : > { %2295 = vtanh.f32 %v1592_v31  ;;  %v1593_v37 = vmul.f32 0.7978846, %v1591_v36 }
 0xb30   : > { %2297 = vtanh.f32 %v1593_v37 }
 0xb38   : > { %v2296_v38 = vpop.eup %2295 }
 0xb39   : > { %v1596_v39 = vadd.f32 1.0, %v2296_v38 }
 0xb3a   : > { %v2298_v40 = vpop.eup %2297 }
 0xb3b   : > { %v1597_v46 = vadd.f32 1.0, %v2298_v40  ;;  %v1598_v48 = vmul.f32 %v1596_v39, %v1582_v43 }
 0xb3d   : > { %v1599_v49 = vmul.f32 %v1597_v46, %v1583_v45 }
 0xb3f   : > { %v1600_v47 = vpack.c.bf16 %v1599_v49, %v1598_v48  ;;  %v1808_v48 = vld [vmem:[%s2813_s2 + $0x8] sm:$0xff] (!%p2085_p5) }
 0xb41   : > { %2212 = vmatmul.mubr.msk.bf16.vlgmr.msra.gmra.mrb[20].mxu1 %vm1640_vm6, %v1600_v47 }
 0xc14   : > { %v1678_v42 = vpop.f32.mrb[20].mxu1 }
 0xc15   : > { %v1679_v52 = vadd.f32 %v2077_v50, %v1678_v42  ;;  %v2213_v53 = vpop.f32.mrb[21].mxu1 }
 0xc16   : > { %v1681_v54 = vpop.f32.mrb[22].mxu1 }
 0xc17   : > { %v1682_v55 = vadd.f32 %v2077_v50, %v1681_v54  ;;  %v2214_v56 = vpop.f32.mrb[23].mxu1  ;;  %v1685_v57 = vadd.f32 %v1679_v52, %v1512_v13 }
 0xc19   : > { %v1689_v58 = vsel %vm891_vm2, %v1685_v57, 0.0  ;;  %v1686_v60 = vadd.f32 %v1682_v55, %v1513_v14  ;;  %v2084_v14 = vld [vmem:[%s785_s18] ss:$0 sm:$0xff] }
 0xc1a   : > { %1690 = vadd.xlane.f32.xlu0 %v1689_v58 }
 0xc1b   : > { %v1692_v61 = vsel %vm891_vm2, %v1686_v60, 0.0 }
 0xc1c   : > { %1693 = vadd.xlane.f32.xlu1 %v1692_v61 }
 0xca7   : > { %v1691_v62 = vpop.xlane.xlu0 %1690 }
 0xca8   : > { %v1695_v33 = vmul.f32 0.03125, %v1691_v62 }
 0xca9   : > { %v1694_v63 = vpop.xlane.xlu1 %1693 }
 0xcaa   : > { %v1697_v34 = vsub.f32 %v1685_v57, %v1695_v33  ;;  %v1696_v1 = vmul.f32 0.03125, %v1694_v63 }
 0xcac   : > { %v1698_v2 = vsub.f32 %v1686_v60, %v1696_v1  ;;  %v1699_v59 = vmul.f32 %v1697_v34, %v1697_v34 }
 0xcae   : > { %v1701_v3 = vsel %vm891_vm2, %v1699_v59, 0.0  ;;  %v1700_v4 = vmul.f32 %v1698_v2, %v1698_v2 }
 0xcaf   : > { %1702 = vadd.xlane.f32.xlu0 %v1701_v3 }
 0xcb0   : > { %v1704_v5 = vsel %vm891_vm2, %v1700_v4, 0.0 }
 0xcb1   : > { %1705 = vadd.xlane.f32.xlu1 %v1704_v5 }
 0xd3c   : > { %v1703_v6 = vpop.xlane.xlu0 %1702 }
 0xd3d   : > { %v1707_v7 = vmul.f32 0.03125, %v1703_v6 }
 0xd3e   : > { %v1706_v0 = vpop.xlane.xlu1 %1705 }
 0xd3f   : > { %v1709_v8 = vadd.f32 1e-12, %v1707_v7  ;;  %v1708_v9 = vmul.f32 0.03125, %v1706_v0 }
 0xd41   : > { %2299 = vrsqrt.f32 %v1709_v8  ;;  %v1710_v10 = vadd.f32 1e-12, %v1708_v9 }
 0xd43   : > { %2301 = vrsqrt.f32 %v1710_v10 }
 0xd4b   : > { %v2300_v44 = vpop.eup %2299 }
 0xd4c   : > { %v1713_v12 = vmul.f32 %v2300_v44, %v1697_v34 }
 0xd4d   : > { %v2302_v13 = vpop.eup %2301 }
 0xd4e   : > { %v1721_v15 = vmul.f32 %v2083_v11, %v1713_v12  ;;  %v1714_v16 = vmul.f32 %v2302_v13, %v1698_v2  ;;  %1736 = sbr.rel (%p2085_p5) target bundleno = 4225 (0x1081), region = 104 }
 0xd50   : > { %v1729_v17 = vadd.f32 %v2084_v14, %v1721_v15  ;;  %v1722_v18 = vmul.f32 %v2083_v11, %v1714_v16 }
 0xd52   : > { %1731 = vst.msk [vmem:[#allocation2] sm:$0xff] %vm891_vm2, %v1729_v17  ;;  %v1730_v19 = vadd.f32 %v2084_v14, %v1722_v18 }
 0xd54   : > { %1732 = vst.msk [vmem:[#allocation2 + $0x8] sm:$0xff] %vm891_vm2, %v1730_v19  ;;  %v1737_v22 = vpack.c.bf16 (!%p2085_p5), %v1730_v19, %v1729_v17 }
 0xd56   : > { %2220 = vmatmul.mubr.msk.bf16.vlgmr.msra.gmra.mrb[0].mxu0 %vm891_vm2, %v1737_v22 }
 0xe29   : > { %v1798_v25 = vpop.f32.mrb[0].mxu0 }
 0xe2a   : > { %v1799_v26 = vadd.f32 %v2086_v24, %v1798_v25  ;;  %v2221_v27 = vpop.f32.mrb[1].mxu0 }
 0xe2b   : > { %v1801_v28 = vpop.f32.mrb[2].mxu0 }
 0xe2c   : > { %1805 = vst [vmem:[%s2812_s20] sm:$0xff] %v1799_v26  ;;  %v1802_v29 = vadd.f32 %v2086_v24, %v1801_v28  ;;  %v2222_v30 = vpop.f32.mrb[3].mxu0  ;;  %v1812_v32 = vsel %vm1811_vm8, %v1799_v26, -1e+30  ;;  %v1834_v31 = vmul.f32 %v1807_v35, %v1799_v26 }
 0xe2d   : > { %1814 = vmax.xlane.f32.xlu0 %v1812_v32 }
 0xe2e   : > { %1806 = vst [vmem:[%s2812_s20 + $0x8] sm:$0xff] %v1802_v29  ;;  %v1813_v51 = vsel %vm1811_vm8, %v1802_v29, -1e+30  ;;  %v1835_v49 = vmul.f32 %v1808_v48, %v1802_v29 }
 0xe31   : > { %1816 = vmax.xlane.f32.xlu0 %v1813_v51 }
 0xe35   : > { %1836 = vadd.xlane.f32.xlu0 %v1834_v31 }
 0xe39   : > { %1840 = vadd.xlane.f32.xlu0 %v1807_v35 }
 0xeba   : > { %v1815_v36 = vpop.xlane.xlu0 %1814 }
 0xebb   : > { %v1818_v37 = vsub.f32 %v1812_v32, %v1815_v36 }
 0xebd   : > { %v1820_v38 = vmul.f32 1.442695, %v1818_v37 }
 0xebe   : > { %v1817_v39 = vpop.xlane.xlu0 %1816 }
 0xebf   : > { %v1819_v40 = vsub.f32 %v1813_v51, %v1817_v39  ;;  %2305 = vpow2.f32 %v1820_v38 }
 0xec1   : > { %v1822_v43 = vmul.f32 1.442695, %v1819_v40 }
 0xec2   : > { %v1837_v50 = vpop.xlane.xlu0 %1836 }
 0xec3   : > { %2307 = vpow2.f32 %v1822_v43 }
 0xec6   : > { %v1841_v53 = vpop.xlane.xlu0 %1840 }
 0xec7   : > { %v1861_v55 = vsel %vm1848_vm9, %v1841_v53, 0.0 }
 0xec9   : > { %v2306_v45 = vpop.eup %2305 }
 0xeca   : > { %1824 = vadd.xlane.f32.xlu1 %v2306_v45 }
 0xecd   : > { %v2308_v46 = vpop.eup %2307 }
 0xece   : > { %1826 = vadd.xlane.f32.xlu1 %v2308_v46 }
 0xed2   : > { %1838 = vadd.xlane.f32.xlu1 %v1835_v49 }
 0xed6   : > { %1842 = vadd.xlane.f32.xlu1 %v1808_v48 }
 0xf57   : > { %v1825_v47 = vpop.xlane.xlu1 %1824 }
 0xf58   : > { %2309 = vlog2.f32 %v1825_v47 }
 0xf5b   : > { %v1827_v42 = vpop.xlane.xlu1 %1826 }
 0xf5c   : > { %2311 = vlog2.f32 %v1827_v42 }
 0xf5f   : > { %v1839_v52 = vpop.xlane.xlu1 %1838 }
 0xf62   : > { %v2310_v54 = vpop.eup %2309 }
 0xf63   : > { %v1829_v56 = vmul.f32 0.6931472, %v2310_v54  ;;  %v1843_v57 = vpop.xlane.xlu1 %1842 }
 0xf64   : > { %v1862_v58 = vsel %vm1848_vm9, %v1843_v57, 0.0 }
 0xf65   : > { %v1832_v60 = vadd.f32 %v1829_v56, %v1815_v36  ;;  %v1863_v61 = vadd.f32 %v1862_v58, %v1861_v55 }
 0xf66   : > { %v2312_v62 = vpop.eup %2311 }
 0xf67   : > { %v1831_v33 = vmul.f32 0.6931472, %v2312_v62  ;;  %v1844_v63 = vsub.f32 %v1832_v60, %v1837_v50  ;;  %1864 = vadd.xlane.f32.xlu1 %v1863_v61 }
 0xf69   : > { %v1833_v34 = vadd.f32 %v1831_v33, %v1817_v39  ;;  %v1846_v2 = vmul.f32 %v1844_v63, %v1841_v53 }
 0xf6b   : > { %v1845_v1 = vsub.f32 %v1833_v34, %v1839_v52  ;;  %v1849_v3 = vsel %vm1848_vm9, %v1846_v2, 0.0 }
 0xf6d   : > { %v1847_v59 = vmul.f32 %v1845_v1, %v1843_v57 }
 0xf6f   : > { %v1850_v4 = vsel %vm1848_vm9, %v1847_v59, 0.0 }
 0xf70   : > { %v1851_v5 = vadd.f32 %v1850_v4, %v1849_v3 }
 0xf72   : > { %1852 = vadd.xlane.f32.xlu0 %v1851_v5 }
 0xff4   : > { %v1865_v6 = vpop.xlane.xlu1 %1864 }
 0xff5   : > { %v1866_v7 = vrot.slane %v1865_v6, 4 }
 0xff7   : > { %v1867_v0 = vadd.f32 %v1866_v7, %v1865_v6 }
 0xff9   : > { %v1868_v8 = vrot.slane %v1867_v0, 2 }
 0xffb   : > { %v1869_v11 = vadd.f32 %v1868_v8, %v1867_v0 }
 0xffd   : > { %v1870_v14 = vrot.slane %v1869_v11, 1 }
 0xfff   : > { %v1853_v9 = vpop.xlane.xlu0 %1852  ;;  %v1871_v17 = vadd.f32 %v1870_v14, %v1869_v11 }
0x1000   : > { %v1854_v10 = vrot.slane %v1853_v9, 4 }
0x1002   : > { %v1855_v44 = vadd.f32 %v1854_v10, %v1853_v9 }
0x1004   : > { %v1856_v12 = vrot.slane %v1855_v44, 2 }
0x1006   : > { %v1857_v13 = vadd.f32 %v1856_v12, %v1855_v44 }
0x1008   : > { %v1858_v15 = vrot.slane %v1857_v13, 1 }
0x100a   : > { %v1859_v16 = vadd.f32 %v1858_v15, %v1857_v13 }
0x100c   : > { %2223 = vpush %v1859_v16 }
0x100d   : > { %2225 = vpush %v1871_v17 }
0x103d   : > { %s2224_s30 = spop %2223 }
0x103e   : > { %s2226_s26 = spop %2225 }
0x103f   : > { %s1873_s18 = smax.f32 %s2350_s4, %s2226_s26 }
0x1040   : > { %v1874_v18 = vstv %s1873_s18 }
0x1041   : > { %2313 = vrcp.f32 %v1874_v18 }
0x104b   : > { %v2314_v19 = vpop.eup %2313 }
0x104c   : > { %2227 = vpush %v2314_v19 }
0x107d   : > { %s2228_s23 = spop %2227 }
0x107e   : > { %s1877_s17 = smul.f32 %s2228_s23, %s2224_s30 }
0x1080   : > { %1879 = sst [smem:[#allocation3]] %s1877_s17 }
0x1081 PF: > { %p2233_p6 = scmp.eq.s32.totalorder %s2463_s22, 1  ;;  %s2814_s5 = sld [smem:[#allocation16_spill]] }
0x1087   : > { %s2315_s19 = scalar_lea.hbm %s2814_s5, 16 }
0x1088   : > { %p2316_p7 = scmp.ne.s32.totalorder %s2814_s5, %s2315_s19  ;;  %p2321_p10 = scmp.lt.u32.totalorder %s2315_s19, %s2814_s5 }
0x108a   : > { %p2317_p8 = pnand %p2316_p7, %p2233_p6 }
0x108c   : > { %p2318_p9 = pneg %p2317_p8 }
0x108e   : > { %p2323_p11 = pnand %p2321_p10, %p2318_p9 }
0x1090   : > { %2326 = shalt.err (!%p2323_p11)
}
0x1091   : > { %s2351_s27 = smov [#allocation3]  }
0x1092   : > { %2230 = dma.smem_to_hbm (%p2233_p6), %s2351_s27, 16, %s2814_s5, [#allocation4]  }
0x1093   : > { %2332 = dma.done.wait (%p2233_p6), [#allocation4], 16  }
0x1094   : > { %2334 = vsyncadd (%p2233_p6), [#allocation4], 4294967280 }
0x1095   : > { %1899 = sfence }
0x1096 PF: > { %s2815_s22 = sld [smem:[#allocation6_spill]] }
0x109c   : > { %s32_s1 = sadd.s32 1, %s2815_s22  }
0x109d   : > { %p29_p12 = scmp.ge.s32.totalorder %s32_s1, 4  }
0x109f   :  { %31 = sbr.rel (!%p29_p12) target bundleno = 13 (0xd), region = 173 }
0x10a6   :  { %1905 = vsyncpa [#allocation4], 1 }
0x10a7   :  { %1907 = vsyncpa [#allocation4 + $0x1], 1 }

</bundles_post_ra>
